<compile_context>
chip_gen: v7x
topology: tpu7x:2x2x1
jax: 0.10.0
libtpu: 0.0.40
codegen_flags: <defaults>
</compile_context>

<pallas_src>
import jax
import jax.numpy as jnp
from jax.experimental import pallas as pl
from jax.experimental.pallas import tpu as pltpu


def _narx_kernel(x_ref, yprev_ref,
                 w1x_ref, w1y_ref, b1_ref,
                 w2_ref, b2_ref,
                 w3_ref, b3_ref,
                 w4_ref, b4_ref,
                 out_ref):
    x = x_ref[...]
    y_prev = yprev_ref[...]

    # Split first layer: two MXU dots into one f32 accumulator instead of a
    # lane-splicing concat at feature offset 96.
    h1 = jnp.tanh(
        jnp.dot(x, w1x_ref[...], preferred_element_type=jnp.float32)
        + jnp.dot(y_prev, w1y_ref[...], preferred_element_type=jnp.float32)
        + b1_ref[...])
    h2 = jnp.tanh(jnp.dot(h1, w2_ref[...],
                          preferred_element_type=jnp.float32) + b2_ref[...])
    h3 = jnp.tanh(jnp.dot(h2, w3_ref[...],
                          preferred_element_type=jnp.float32) + b3_ref[...])
    logits = jnp.dot(h3, w4_ref[...],
                     preferred_element_type=jnp.float32) + b4_ref[...]

    # softmax over dim=1 (feature axis), numerically stable.
    # Exact reciprocal kept so results match the f32 reference to 1e-5.
    m = jnp.max(logits, axis=1, keepdims=True)
    e = jnp.exp(logits - m)
    denom = jnp.sum(e, axis=1, keepdims=True)
    out_ref[...] = e * pl.reciprocal(denom, approx=False)


def narx_forward(x, y_prev, params, *, tile_b=256):
    """NARX forward. Tiles the batch over a parallel grid; weights stay resident."""
    B = x.shape[0]
    in_x = x.shape[1]        # 96
    in_y = y_prev.shape[1]   # 10
    out_dim = params["w4"].shape[1]

    # Pad batch up to a multiple of the tile (padded rows are sliced off at
    # the end; softmax of bias-only rows is finite so no NaNs leak in).
    n_tiles = pl.cdiv(B, tile_b)
    B_pad = n_tiles * tile_b
    if B_pad != B:
        x = jnp.pad(x, ((0, B_pad - B), (0, 0)))
        y_prev = jnp.pad(y_prev, ((0, B_pad - B), (0, 0)))

    # Static slice of the first-layer weight: avoids in-kernel concat.
    w1x = params["w1"][:in_x]     # (96, 10)
    w1y = params["w1"][in_x:]     # (10, 10)

    def batch_spec(feat):
        return pl.BlockSpec((tile_b, feat), lambda i: (i, 0))

    def resident_spec(arr):
        # Full-extent block, constant index -> DMA'd once, resident across grid.
        return pl.BlockSpec(arr.shape, lambda i: (0, 0))

    out = pl.pallas_call(
        _narx_kernel,
        out_shape=jax.ShapeDtypeStruct((B_pad, out_dim), jnp.float32),
        grid=(n_tiles,),
        in_specs=[
            batch_spec(in_x),            # x tile
            batch_spec(in_y),            # y_prev tile
            resident_spec(w1x),
            resident_spec(w1y),
            resident_spec(params["b1"]),
            resident_spec(params["w2"]),
            resident_spec(params["b2"]),
            resident_spec(params["w3"]),
            resident_spec(params["b3"]),
            resident_spec(params["w4"]),
            resident_spec(params["b4"]),
        ],
        out_specs=batch_spec(out_dim),
        compiler_params=pltpu.CompilerParams(
            dimension_semantics=("parallel",)),
    )(x, y_prev, w1x, w1y,
      params["b1"], params["w2"], params["b2"],
      params["w3"], params["b3"], params["w4"], params["b4"])

    return out[:B]


def init_params(key):
    """Deterministic init mimicking PyTorch Linear default: U(-1/sqrt(fan_in), 1/sqrt(fan_in))."""
    input_dim = 96 + 10
    hidden_dims = [10, 20, 10]
    output_dim = 10
    dims = [input_dim] + hidden_dims + [output_dim]

    params = {}
    keys = jax.random.split(key, 2 * (len(dims) - 1))
    for i in range(len(dims) - 1):
        fan_in, fan_out = dims[i], dims[i + 1]
        bound = 1.0 / jnp.sqrt(jnp.float32(fan_in))
        w = jax.random.uniform(keys[2 * i], (fan_in, fan_out),
                               minval=-bound, maxval=bound, dtype=jnp.float32)
        b = jax.random.uniform(keys[2 * i + 1], (1, fan_out),
                               minval=-bound, maxval=bound, dtype=jnp.float32)
        params[f"w{i + 1}"] = w
        params[f"b{i + 1}"] = b
    return params


def narx_reference(x, y_prev, params):
    """Pure-JAX reference for correctness check."""
    h = jnp.concatenate([x, y_prev], axis=1)
    h = jnp.tanh(h @ params["w1"] + params["b1"])
    h = jnp.tanh(h @ params["w2"] + params["b2"])
    h = jnp.tanh(h @ params["w3"] + params["b3"])
    logits = h @ params["w4"] + params["b4"]
    return jax.nn.softmax(logits, axis=1)


if __name__ == "__main__":
    key = jax.random.PRNGKey(0)
    k_params, k_x, k_y = jax.random.split(key, 3)

    params = init_params(k_params)

    B = 2
    x = jax.random.normal(k_x, (B, 96), dtype=jnp.float32)
    y_prev = jax.random.normal(k_y, (B, 10), dtype=jnp.float32)

    out = narx_forward(x, y_prev, params)
    out = jax.block_until_ready(out)

    ref = narx_reference(x, y_prev, params)
    assert out.shape == (B, 10)
    assert jnp.allclose(out, ref, atol=1e-5, rtol=1e-5), "mismatch vs reference"
    assert jnp.allclose(jnp.sum(out, axis=1), jnp.ones((B,)), atol=1e-5)

    print("KERNEL_OK")
</pallas_src>

<mosaic_0001>
module attributes {stable_mosaic.version = 11 : i64} {
  func.func @_narx_kernel(%arg0: i32, %arg1: memref<256x96xf32, #tpu.memory_space<vmem>>, %arg2: memref<256x10xf32, #tpu.memory_space<vmem>>, %arg3: memref<96x10xf32, #tpu.memory_space<vmem>>, %arg4: memref<10x10xf32, #tpu.memory_space<vmem>>, %arg5: memref<1x10xf32, #tpu.memory_space<vmem>>, %arg6: memref<10x20xf32, #tpu.memory_space<vmem>>, %arg7: memref<1x20xf32, #tpu.memory_space<vmem>>, %arg8: memref<20x10xf32, #tpu.memory_space<vmem>>, %arg9: memref<1x10xf32, #tpu.memory_space<vmem>>, %arg10: memref<10x10xf32, #tpu.memory_space<vmem>>, %arg11: memref<1x10xf32, #tpu.memory_space<vmem>>, %arg12: memref<256x10xf32, #tpu.memory_space<vmem>>) attributes {dimension_semantics = [#tpu.dimension_semantics<parallel>], iteration_bounds = array<i64: 1>, scalar_prefetch = 0 : i64, scratch_operands = 0 : i64, tpu.core_type = #tpu.core_type<tc>, window_params = [{transform_indices = @transform_0, window_bounds = array<i64: 256, 96>}, {transform_indices = @transform_1, window_bounds = array<i64: 256, 10>}, {pipeline_mode = #tpu.pipeline_mode<synchronous>, transform_indices = @transform_2, window_bounds = array<i64: 96, 10>}, {pipeline_mode = #tpu.pipeline_mode<synchronous>, transform_indices = @transform_3, window_bounds = array<i64: 10, 10>}, {pipeline_mode = #tpu.pipeline_mode<synchronous>, transform_indices = @transform_4, window_bounds = array<i64: 1, 10>}, {pipeline_mode = #tpu.pipeline_mode<synchronous>, transform_indices = @transform_5, window_bounds = array<i64: 10, 20>}, {pipeline_mode = #tpu.pipeline_mode<synchronous>, transform_indices = @transform_6, window_bounds = array<i64: 1, 20>}, {pipeline_mode = #tpu.pipeline_mode<synchronous>, transform_indices = @transform_7, window_bounds = array<i64: 20, 10>}, {pipeline_mode = #tpu.pipeline_mode<synchronous>, transform_indices = @transform_8, window_bounds = array<i64: 1, 10>}, {pipeline_mode = #tpu.pipeline_mode<synchronous>, transform_indices = @transform_9, window_bounds = array<i64: 10, 10>}, {pipeline_mode = #tpu.pipeline_mode<synchronous>, transform_indices = @transform_10, window_bounds = array<i64: 1, 10>}, {transform_indices = @transform_11, window_bounds = array<i64: 256, 10>}]} {
    %c0 = arith.constant 0 : index
    %c0_0 = arith.constant 0 : index
    %0 = vector.load %arg1[%c0, %c0_0] : memref<256x96xf32, #tpu.memory_space<vmem>>, vector<256x96xf32>
    %c0_1 = arith.constant 0 : index
    %c0_2 = arith.constant 0 : index
    %1 = vector.load %arg2[%c0_1, %c0_2] : memref<256x10xf32, #tpu.memory_space<vmem>>, vector<256x10xf32>
    %c0_3 = arith.constant 0 : index
    %c0_4 = arith.constant 0 : index
    %2 = vector.load %arg3[%c0_3, %c0_4] : memref<96x10xf32, #tpu.memory_space<vmem>>, vector<96x10xf32>
    %cst = arith.constant dense<0.000000e+00> : vector<256x10xf32>
    %3 = tpu.matmul %0, %2, %cst {dimension_numbers = #tpu.dot_dimension_numbers<[1], [0], [0], [1], [0, 0, 1, 1], [], []>} : vector<256x96xf32>, vector<96x10xf32>, vector<256x10xf32> -> vector<256x10xf32>
    %c0_5 = arith.constant 0 : index
    %c0_6 = arith.constant 0 : index
    %4 = vector.load %arg4[%c0_5, %c0_6] : memref<10x10xf32, #tpu.memory_space<vmem>>, vector<10x10xf32>
    %cst_7 = arith.constant dense<0.000000e+00> : vector<256x10xf32>
    %5 = tpu.matmul %1, %4, %cst_7 {dimension_numbers = #tpu.dot_dimension_numbers<[1], [0], [0], [1], [0, 0, 1, 1], [], []>} : vector<256x10xf32>, vector<10x10xf32>, vector<256x10xf32> -> vector<256x10xf32>
    %6 = arith.addf %3, %5 : vector<256x10xf32>
    %c0_8 = arith.constant 0 : index
    %c0_9 = arith.constant 0 : index
    %7 = vector.load %arg5[%c0_8, %c0_9] : memref<1x10xf32, #tpu.memory_space<vmem>>, vector<1x10xf32>
    %8 = vector.broadcast %7 : vector<1x10xf32> to vector<256x10xf32>
    %9 = arith.addf %6, %8 : vector<256x10xf32>
    %10 = math.tanh %9 : vector<256x10xf32>
    %c0_10 = arith.constant 0 : index
    %c0_11 = arith.constant 0 : index
    %11 = vector.load %arg6[%c0_10, %c0_11] : memref<10x20xf32, #tpu.memory_space<vmem>>, vector<10x20xf32>
    %cst_12 = arith.constant dense<0.000000e+00> : vector<256x20xf32>
    %12 = tpu.matmul %10, %11, %cst_12 {dimension_numbers = #tpu.dot_dimension_numbers<[1], [0], [0], [1], [0, 0, 1, 1], [], []>} : vector<256x10xf32>, vector<10x20xf32>, vector<256x20xf32> -> vector<256x20xf32>
    %c0_13 = arith.constant 0 : index
    %c0_14 = arith.constant 0 : index
    %13 = vector.load %arg7[%c0_13, %c0_14] : memref<1x20xf32, #tpu.memory_space<vmem>>, vector<1x20xf32>
    %14 = vector.broadcast %13 : vector<1x20xf32> to vector<256x20xf32>
    %15 = arith.addf %12, %14 : vector<256x20xf32>
    %16 = math.tanh %15 : vector<256x20xf32>
    %c0_15 = arith.constant 0 : index
    %c0_16 = arith.constant 0 : index
    %17 = vector.load %arg8[%c0_15, %c0_16] : memref<20x10xf32, #tpu.memory_space<vmem>>, vector<20x10xf32>
    %cst_17 = arith.constant dense<0.000000e+00> : vector<256x10xf32>
    %18 = tpu.matmul %16, %17, %cst_17 {dimension_numbers = #tpu.dot_dimension_numbers<[1], [0], [0], [1], [0, 0, 1, 1], [], []>} : vector<256x20xf32>, vector<20x10xf32>, vector<256x10xf32> -> vector<256x10xf32>
    %c0_18 = arith.constant 0 : index
    %c0_19 = arith.constant 0 : index
    %19 = vector.load %arg9[%c0_18, %c0_19] : memref<1x10xf32, #tpu.memory_space<vmem>>, vector<1x10xf32>
    %20 = vector.broadcast %19 : vector<1x10xf32> to vector<256x10xf32>
    %21 = arith.addf %18, %20 : vector<256x10xf32>
    %22 = math.tanh %21 : vector<256x10xf32>
    %c0_20 = arith.constant 0 : index
    %c0_21 = arith.constant 0 : index
    %23 = vector.load %arg10[%c0_20, %c0_21] : memref<10x10xf32, #tpu.memory_space<vmem>>, vector<10x10xf32>
    %cst_22 = arith.constant dense<0.000000e+00> : vector<256x10xf32>
    %24 = tpu.matmul %22, %23, %cst_22 {dimension_numbers = #tpu.dot_dimension_numbers<[1], [0], [0], [1], [0, 0, 1, 1], [], []>} : vector<256x10xf32>, vector<10x10xf32>, vector<256x10xf32> -> vector<256x10xf32>
    %c0_23 = arith.constant 0 : index
    %c0_24 = arith.constant 0 : index
    %25 = vector.load %arg11[%c0_23, %c0_24] : memref<1x10xf32, #tpu.memory_space<vmem>>, vector<1x10xf32>
    %26 = vector.broadcast %25 : vector<1x10xf32> to vector<256x10xf32>
    %27 = arith.addf %24, %26 : vector<256x10xf32>
    %cst_25 = arith.constant dense<0xFF800000> : vector<256xf32>
    %28 = vector.multi_reduction <maximumf>, %27, %cst_25 [1] : vector<256x10xf32> to vector<256xf32>
    %29 = vector.shape_cast %28 : vector<256xf32> to vector<256x1xf32>
    %30 = vector.broadcast %29 : vector<256x1xf32> to vector<256x10xf32>
    %31 = arith.subf %27, %30 : vector<256x10xf32>
    %32 = math.exp %31 : vector<256x10xf32>
    %cst_26 = arith.constant dense<0.000000e+00> : vector<256xf32>
    %33 = vector.multi_reduction <add>, %32, %cst_26 [1] : vector<256x10xf32> to vector<256xf32>
    %34 = vector.shape_cast %33 : vector<256xf32> to vector<256x1xf32>
    %35 = tpu.reciprocal %34 : vector<256x1xf32> -> vector<256x1xf32>
    %36 = vector.broadcast %35 : vector<256x1xf32> to vector<256x10xf32>
    %37 = arith.mulf %32, %36 : vector<256x10xf32>
    %c0_27 = arith.constant 0 : index
    %c0_28 = arith.constant 0 : index
    %38 = vector.load %arg12[%c0_27, %c0_28] : memref<256x10xf32, #tpu.memory_space<vmem>>, vector<256x10xf32>
    tpu.vector_store %arg12[%c0_27, %c0_28], %37 {strides = array<i32>} : memref<256x10xf32, #tpu.memory_space<vmem>>, vector<256x10xf32>,
    return
  }
  func.func @transform_0(%arg0: i32) -> (i32, i32) {
    %c0_i32 = arith.constant 0 : i32
    %c0_i32_0 = arith.constant 0 : i32
    return %arg0, %c0_i32 : i32, i32
  }
  func.func @transform_1(%arg0: i32) -> (i32, i32) {
    %c0_i32 = arith.constant 0 : i32
    %c0_i32_0 = arith.constant 0 : i32
    return %arg0, %c0_i32 : i32, i32
  }
  func.func @transform_2(%arg0: i32) -> (i32, i32) {
    %c0_i32 = arith.constant 0 : i32
    %c0_i32_0 = arith.constant 0 : i32
    %c0_i32_1 = arith.constant 0 : i32
    return %c0_i32, %c0_i32_0 : i32, i32
  }
  func.func @transform_3(%arg0: i32) -> (i32, i32) {
    %c0_i32 = arith.constant 0 : i32
    %c0_i32_0 = arith.constant 0 : i32
    %c0_i32_1 = arith.constant 0 : i32
    return %c0_i32, %c0_i32_0 : i32, i32
  }
  func.func @transform_4(%arg0: i32) -> (i32, i32) {
    %c0_i32 = arith.constant 0 : i32
    %c0_i32_0 = arith.constant 0 : i32
    %c0_i32_1 = arith.constant 0 : i32
    return %c0_i32, %c0_i32_0 : i32, i32
  }
  func.func @transform_5(%arg0: i32) -> (i32, i32) {
    %c0_i32 = arith.constant 0 : i32
    %c0_i32_0 = arith.constant 0 : i32
    %c0_i32_1 = arith.constant 0 : i32
    return %c0_i32, %c0_i32_0 : i32, i32
  }
  func.func @transform_6(%arg0: i32) -> (i32, i32) {
    %c0_i32 = arith.constant 0 : i32
    %c0_i32_0 = arith.constant 0 : i32
    %c0_i32_1 = arith.constant 0 : i32
    return %c0_i32, %c0_i32_0 : i32, i32
  }
  func.func @transform_7(%arg0: i32) -> (i32, i32) {
    %c0_i32 = arith.constant 0 : i32
    %c0_i32_0 = arith.constant 0 : i32
    %c0_i32_1 = arith.constant 0 : i32
    return %c0_i32, %c0_i32_0 : i32, i32
  }
  func.func @transform_8(%arg0: i32) -> (i32, i32) {
    %c0_i32 = arith.constant 0 : i32
    %c0_i32_0 = arith.constant 0 : i32
    %c0_i32_1 = arith.constant 0 : i32
    return %c0_i32, %c0_i32_0 : i32, i32
  }
  func.func @transform_9(%arg0: i32) -> (i32, i32) {
    %c0_i32 = arith.constant 0 : i32
    %c0_i32_0 = arith.constant 0 : i32
    %c0_i32_1 = arith.constant 0 : i32
    return %c0_i32, %c0_i32_0 : i32, i32
  }
  func.func @transform_10(%arg0: i32) -> (i32, i32) {
    %c0_i32 = arith.constant 0 : i32
    %c0_i32_0 = arith.constant 0 : i32
    %c0_i32_1 = arith.constant 0 : i32
    return %c0_i32, %c0_i32_0 : i32, i32
  }
  func.func @transform_11(%arg0: i32) -> (i32, i32) {
    %c0_i32 = arith.constant 0 : i32
    %c0_i32_0 = arith.constant 0 : i32
    return %arg0, %c0_i32 : i32, i32
  }
}

</mosaic_0001>

<bundles_post_ra>
// kernel: tpu_custom_call.1
= control target key start
LH: loop header
LB: loop body
LE: loop exit
PB: predicated region body
PF: predicated region fallthrough
CT: control target
= control target key end

     0   :  { %vm213_vm0 = vcmask 1041408   ;;  %vm116_vm1 = vcmask 80896   ;;  %vm3321_vm2 = vmmov 1   ;;  %vm442_vm4 = vcmask 785408   ;;  %s4463_s3 = inlined_call_operand.vmem [shape: f32[10,10], index: 3, kind: input, shape index: {}]   ;;  %s4464_s1 = inlined_call_operand.vmem [shape: f32[256,10], index: 1, kind: input, shape index: {}]   ;;  %s4465_s2 = inlined_call_operand.vmem [shape: f32[96,10], index: 2, kind: input, shape index: {}]   ;;  %s4466_s5 = inlined_call_operand.vmem [shape: f32[10,20], index: 5, kind: input, shape index: {}]   ;;  %s4467_s0 = inlined_call_operand.vmem [shape: f32[256,96], index: 0, kind: input, shape index: {}]   ;;  %s4468_s7 = inlined_call_operand.vmem [shape: f32[20,10], index: 7, kind: input, shape index: {}]   ;;  %s4469_s4 = inlined_call_operand.vmem [shape: f32[1,10], index: 4, kind: input, shape index: {}]   ;;  %s4470_s9 = inlined_call_operand.vmem [shape: f32[10,10], index: 9, kind: input, shape index: {}]   ;;  %s4471_s6 = inlined_call_operand.vmem [shape: f32[1,20], index: 6, kind: input, shape index: {}]   ;;  %s4472_s8 = inlined_call_operand.vmem [shape: f32[1,10], index: 8, kind: input, shape index: {}]   ;;  %s4473_s10 = inlined_call_operand.vmem [shape: f32[1,10], index: 10, kind: input, shape index: {}]   ;;  %s4474_s11 = inlined_call_operand.vmem [shape: f32[256,10], index: 11, kind: output, shape index: {}]  }
   0x1   :  { %v114_v0 = vld [vmem:[%s4463_s3] sm:$0xff]  ;;  %v115_v1 = vld [vmem:[%s4463_s3 + $0x8] sm:$0x3]  ;;  %vm3388_vm3 = vmpackc.low %vm213_vm0, %vm3321_vm2  ;;  %vm1307_vm5 = vcmask 1043456   ;;  %vm1210_vm6 = vcmask 162816  }
   0x2   :  { %v2920_v3 = vpack.c.bf16 %v115_v1, %v114_v0  ;;  %v70_v4 = vld [vmem:[%s4464_s1] sm:$0xff]  ;;  %v103_v6 = vld [vmem:[%s4465_s2 + $0x8] sm:$0xff]  ;;  %v104_v8 = vld [vmem:[%s4465_s2 + $0x10] sm:$0xff] }
   0x3   :  { %v102_v5 = vld [vmem:[%s4465_s2] sm:$0xff]  ;;  %2642 = vmatprep.mubr.msk.f32.mxu0 %vm116_vm1, %v70_v4  ;;  %v105_v9 = vld [vmem:[%s4465_s2 + $0x18] sm:$0xff]  ;;  %v71_v10 = vld [vmem:[%s4464_s1 + $0x8] sm:$0xff] }
   0x4   :  { %2922 = vmatprep.subr.msk.bf16.mxu0 %vm3388_vm3, %v2920_v3  ;;  %v2926_v7 = vpack.c.bf16 %v103_v6, %v102_v5  ;;  %2966 = vmatprep.subr.msk.bf16.mxu1 %vm3388_vm3, %v2920_v3  ;;  %v72_v11 = vld [vmem:[%s4464_s1 + $0x10] sm:$0xff]  ;;  %v2930_v12 = vpack.c.bf16 %v105_v9, %v104_v8  ;;  %v106_v13 = vld [vmem:[%s4465_s2 + $0x20] sm:$0xff]  ;;  %v107_v14 = vld [vmem:[%s4465_s2 + $0x28] sm:$0xff] }
   0x5   :  { %2925 = vmatpush3.bf16.msk.msra.mxu0 %vm3388_vm3, %v2920_v3  ;;  %2967 = vmatpush3.bf16.msk.msra.mxu1 %vm3388_vm3, %v2920_v3  ;;  %v73_v15 = vld [vmem:[%s4464_s1 + $0x18] sm:$0xff]  ;;  %v74_v16 = vld [vmem:[%s4464_s1 + $0x20] sm:$0xff]  ;;  %v2934_v17 = vpack.c.bf16 %v107_v14, %v106_v13  ;;  %v108_v18 = vld [vmem:[%s4465_s2 + $0x30] sm:$0xff] }
   0x6   :  { %2927 = vmatprep.subr.bf16.mxu0 %v2926_v7  ;;  %v109_v19 = vld [vmem:[%s4465_s2 + $0x38] sm:$0xff]  ;;  %v75_v20 = vld [vmem:[%s4464_s1 + $0x28] sm:$0xff]  ;;  %v76_v21 = vld [vmem:[%s4464_s1 + $0x30] sm:$0xff] }
   0x7   :  { %v2938_v22 = vpack.c.bf16 %v109_v19, %v108_v18  ;;  %v110_v23 = vld [vmem:[%s4465_s2 + $0x40] sm:$0xff]  ;;  %v111_v24 = vld [vmem:[%s4465_s2 + $0x48] sm:$0xff]  ;;  %v77_v26 = vld [vmem:[%s4464_s1 + $0x38] sm:$0xff] }
   0x8   :  { %2643 = vmatmul.mubr.msk.f32.vlgmr.msra.gmra.mrb[0].mxu0 %vm116_vm1, %v71_v10  ;;  %v86_v25 = vld [vmem:[%s4464_s1 + $0x80] sm:$0xff]  ;;  %v87_v27 = vld [vmem:[%s4464_s1 + $0x88] sm:$0xff]  ;;  %v2942_v29 = vpack.c.bf16 %v111_v24, %v110_v23  ;;  %v88_v30 = vld [vmem:[%s4464_s1 + $0x90] sm:$0xff] }
   0x9   :  { %2929 = vmatpush3.bf16.msra.mxu0 %v2926_v7  ;;  %2645 = vmatprep.mubr.msk.f32.mxu0 %vm116_vm1, %v72_v11  ;;  %v78_v28 = vld [vmem:[%s4464_s1 + $0x40] sm:$0xff]  ;;  %v112_v31 = vld [vmem:[%s4465_s2 + $0x50] sm:$0xff]  ;;  %v113_v32 = vld [vmem:[%s4465_s2 + $0x58] sm:$0xff] }
   0xa   :  { %2931 = vmatprep.subr.bf16.mxu0 %v2930_v12  ;;  %2666 = vmatprep.mubr.msk.f32.mxu1 %vm116_vm1, %v86_v25  ;;  %v89_v33 = vld [vmem:[%s4464_s1 + $0x98] sm:$0xff]  ;;  %v79_v34 = vld [vmem:[%s4464_s1 + $0x48] sm:$0xff]  ;;  %v90_v35 = vld [vmem:[%s4464_s1 + $0xa0] sm:$0xff]  ;;  %v2946_v37 = vpack.c.bf16 %v113_v32, %v112_v31 }
   0xb   :  { %2667 = vmatmul.mubr.msk.f32.vlgmr.msra.gmra.mrb[0].mxu1 %vm116_vm1, %v87_v27  ;;  %v80_v36 = vld [vmem:[%s4464_s1 + $0x50] sm:$0xff]  ;;  %v91_v38 = vld [vmem:[%s4464_s1 + $0xa8] sm:$0xff]  ;;  %v81_v39 = vld [vmem:[%s4464_s1 + $0x58] sm:$0xff] }
   0xc   :  { %2646 = vmatmul.mubr.msk.f32.gmra.mrb[2].mxu0 %vm116_vm1, %v73_v15  ;;  %2669 = vmatprep.mubr.msk.f32.mxu1 %vm116_vm1, %v88_v30  ;;  %v92_v40 = vld [vmem:[%s4464_s1 + $0xb0] sm:$0xff]  ;;  %v82_v41 = vld [vmem:[%s4464_s1 + $0x60] sm:$0xff]  ;;  %v836_v43 = vld [vmem:[%s4466_s5 + $0x8] sm:$0x3] }
   0xd   :  { %2648 = vmatprep.mubr.msk.f32.mxu0 %vm116_vm1, %v74_v16  ;;  %2933 = vmatpush3.bf16.msra.mxu0 %v2930_v12  ;;  %v835_v42 = vld [vmem:[%s4466_s5] sm:$0xff]  ;;  %v93_v44 = vld [vmem:[%s4464_s1 + $0xb8] sm:$0xff]  ;;  %v83_v46 = vld [vmem:[%s4464_s1 + $0x68] sm:$0xff] }
   0xe   :  { %2935 = vmatprep.subr.bf16.mxu0 %v2934_v17  ;;  %v2950_v45 = vpack.c.bf16 %v836_v43, %v835_v42  ;;  %v94_v47 = vld [vmem:[%s4464_s1 + $0xc0] sm:$0xff]  ;;  %v84_v48 = vld [vmem:[%s4464_s1 + $0x70] sm:$0xff]  ;;  %v95_v49 = vld [vmem:[%s4464_s1 + $0xc8] sm:$0xff] }
   0xf   :  { %2670 = vmatmul.mubr.msk.f32.gmra.mrb[2].mxu1 %vm116_vm1, %v89_v33  ;;  %v85_v50 = vld [vmem:[%s4464_s1 + $0x78] sm:$0xff]  ;;  %v96_v51 = vld [vmem:[%s4464_s1 + $0xd0] sm:$0xff]  ;;  %v38_v52 = vld [vmem:[%s4467_s0] sm:$0xff] }
  0x10   :  { %2649 = vmatmul.mubr.msk.f32.gmra.mrb[4].mxu0 %vm116_vm1, %v75_v20  ;;  %2672 = vmatprep.mubr.msk.f32.mxu1 %vm116_vm1, %v90_v35  ;;  %v97_v53 = vld [vmem:[%s4464_s1 + $0xd8] sm:$0xff]  ;;  %v39_v54 = vld [vmem:[%s4467_s0 + $0x8] sm:$0xff]  ;;  %v98_v55 = vld [vmem:[%s4464_s1 + $0xe0] sm:$0xff] }
  0x11   :  { %2651 = vmatprep.mubr.msk.f32.mxu0 %vm116_vm1, %v76_v21  ;;  %2937 = vmatpush3.bf16.msra.mxu0 %v2934_v17  ;;  %v40_v56 = vld [vmem:[%s4467_s0 + $0x10] sm:$0xff]  ;;  %v99_v57 = vld [vmem:[%s4464_s1 + $0xe8] sm:$0xff]  ;;  %v41_v58 = vld [vmem:[%s4467_s0 + $0x18] sm:$0xff] }
  0x12   :  { %2939 = vmatprep.subr.bf16.mxu0 %v2938_v22  ;;  %2952 = vmatprep.subr.msk.bf16.mxu1 %vm3388_vm3, %v2950_v45  ;;  %v100_v59 = vld [vmem:[%s4464_s1 + $0xf0] sm:$0xff]  ;;  %v42_v60 = vld [vmem:[%s4467_s0 + $0x20] sm:$0xff]  ;;  %v101_v61 = vld [vmem:[%s4464_s1 + $0xf8] sm:$0xff] }
  0x13   :  { %2673 = vmatmul.mubr.msk.f32.gmra.mrb[4].mxu1 %vm116_vm1, %v91_v38  ;;  %v43_v62 = vld [vmem:[%s4467_s0 + $0x28] sm:$0xff]  ;;  %v44_v63 = vld [vmem:[%s4467_s0 + $0x30] sm:$0xff]  ;;  %v45_v0 = vld [vmem:[%s4467_s0 + $0x38] sm:$0xff] }
  0x14   :  { %2652 = vmatmul.mubr.msk.f32.gmra.mrb[6].mxu0 %vm116_vm1, %v77_v26  ;;  %2675 = vmatprep.mubr.msk.f32.mxu1 %vm116_vm1, %v92_v40  ;;  %v46_v1 = vld [vmem:[%s4467_s0 + $0x40] sm:$0xff]  ;;  %v47_v3 = vld [vmem:[%s4467_s0 + $0x48] sm:$0xff]  ;;  %v48_v4 = vld [vmem:[%s4467_s0 + $0x50] sm:$0xff] }
  0x15   :  { %2654 = vmatprep.mubr.msk.f32.mxu0 %vm116_vm1, %v78_v28  ;;  %2941 = vmatpush3.bf16.msra.mxu0 %v2938_v22  ;;  %v49_v5 = vld [vmem:[%s4467_s0 + $0x58] sm:$0xff]  ;;  %v50_v6 = vld [vmem:[%s4467_s0 + $0x60] sm:$0xff]  ;;  %v51_v7 = vld [vmem:[%s4467_s0 + $0x68] sm:$0xff] }
  0x16   :  { %2943 = vmatprep.subr.bf16.mxu0 %v2942_v29  ;;  %2955 = vmatpush3.bf16.msk.msra.mxu1 %vm3388_vm3, %v2950_v45  ;;  %v52_v8 = vld [vmem:[%s4467_s0 + $0x70] sm:$0xff]  ;;  %v53_v9 = vld [vmem:[%s4467_s0 + $0x78] sm:$0xff]  ;;  %v54_v10 = vld [vmem:[%s4467_s0 + $0x80] sm:$0xff] }
  0x17   :  { %2676 = vmatmul.mubr.msk.f32.gmra.mrb[6].mxu1 %vm116_vm1, %v93_v44  ;;  %v55_v11 = vld [vmem:[%s4467_s0 + $0x88] sm:$0xff]  ;;  %v56_v12 = vld [vmem:[%s4467_s0 + $0x90] sm:$0xff]  ;;  %v57_v13 = vld [vmem:[%s4467_s0 + $0x98] sm:$0xff] }
  0x18   :  { %2655 = vmatmul.mubr.msk.f32.gmra.mrb[8].mxu0 %vm116_vm1, %v79_v34  ;;  %2678 = vmatprep.mubr.msk.f32.mxu1 %vm116_vm1, %v94_v47  ;;  %v58_v14 = vld [vmem:[%s4467_s0 + $0xa0] sm:$0xff]  ;;  %v59_v15 = vld [vmem:[%s4467_s0 + $0xa8] sm:$0xff]  ;;  %v60_v16 = vld [vmem:[%s4467_s0 + $0xb0] sm:$0xff] }
  0x19   :  { %2657 = vmatprep.mubr.msk.f32.mxu0 %vm116_vm1, %v80_v36  ;;  %2945 = vmatpush3.bf16.msra.mxu0 %v2942_v29  ;;  %v61_v17 = vld [vmem:[%s4467_s0 + $0xb8] sm:$0xff]  ;;  %v62_v18 = vld [vmem:[%s4467_s0 + $0xc0] sm:$0xff]  ;;  %v63_v19 = vld [vmem:[%s4467_s0 + $0xc8] sm:$0xff] }
  0x1a   :  { %2947 = vmatprep.subr.bf16.mxu0 %v2946_v37  ;;  %v64_v20 = vld [vmem:[%s4467_s0 + $0xd0] sm:$0xff]  ;;  %v65_v21 = vld [vmem:[%s4467_s0 + $0xd8] sm:$0xff]  ;;  %v66_v22 = vld [vmem:[%s4467_s0 + $0xe0] sm:$0xff] }
  0x1b   :  { %2679 = vmatmul.mubr.msk.f32.gmra.mrb[8].mxu1 %vm116_vm1, %v95_v49  ;;  %v67_v23 = vld [vmem:[%s4467_s0 + $0xe8] sm:$0xff]  ;;  %v68_v24 = vld [vmem:[%s4467_s0 + $0xf0] sm:$0xff]  ;;  %v69_v25 = vld [vmem:[%s4467_s0 + $0xf8] sm:$0xff] }
  0x1c   :  { %2658 = vmatmul.mubr.msk.f32.gmra.mrb[10].mxu0 %vm116_vm1, %v81_v39  ;;  %2681 = vmatprep.mubr.msk.f32.mxu1 %vm116_vm1, %v96_v51  ;;  %v1200_v26 = vld [vmem:[%s4468_s7] sm:$0xff]  ;;  %v1201_v27 = vld [vmem:[%s4468_s7 + $0x8] sm:$0xff] }
  0x1d   :  { %2660 = vmatprep.mubr.msk.f32.mxu0 %vm116_vm1, %v82_v41  ;;  %2949 = vmatpush3.bf16.msra.mxu0 %v2946_v37  ;;  %v2956_v28 = vpack.c.bf16 %v1201_v27, %v1200_v26  ;;  %v3731_v39 = vld [vmem:[%s4469_s4] ss:$0 sm:$0xff] }
  0x1f   :  { %2682 = vmatmul.mubr.msk.f32.gmra.mrb[10].mxu1 %vm116_vm1, %v97_v53  ;;  %2957 = vmatprep.subr.bf16.mxu1 %v2956_v28 }
  0x20   :  { %2661 = vmatmul.mubr.msk.f32.gmra.mrb[12].mxu0 %vm116_vm1, %v83_v46  ;;  %2684 = vmatprep.mubr.msk.f32.mxu1 %vm116_vm1, %v98_v55 }
  0x21   :  { %2663 = vmatprep.mubr.msk.f32.mxu0 %vm116_vm1, %v84_v48 }
  0x23   :  { %2685 = vmatmul.mubr.msk.f32.gmra.mrb[12].mxu1 %vm116_vm1, %v99_v57 }
  0x24   :  { %2664 = vmatmul.mubr.msk.f32.gmra.mrb[14].mxu0 %vm116_vm1, %v85_v50  ;;  %2687 = vmatprep.mubr.msk.f32.mxu1 %vm116_vm1, %v100_v59 }
  0x25   :  { %2714 = vmatprep.mubr.msk.f32.mxu0 %vm442_vm4, %v38_v52 }
  0x27   :  { %2688 = vmatmul.mubr.msk.f32.gmra.mrb[14].mxu1 %vm116_vm1, %v101_v61 }
  0x28   :  { %2715 = vmatmul.mubr.msk.f32.vlgmr.msra.gmra.mrb[0].mxu0 %vm442_vm4, %v39_v54 }
  0x29   :  { %2717 = vmatprep.mubr.msk.f32.mxu0 %vm442_vm4, %v40_v56 }
  0x2c   :  { %2718 = vmatmul.mubr.msk.f32.gmra.mrb[2].mxu0 %vm442_vm4, %v41_v58 }
  0x2d   :  { %2720 = vmatprep.mubr.msk.f32.mxu0 %vm442_vm4, %v42_v60 }
  0x30   :  { %2721 = vmatmul.mubr.msk.f32.gmra.mrb[4].mxu0 %vm442_vm4, %v43_v62 }
  0x31   :  { %2723 = vmatprep.mubr.msk.f32.mxu0 %vm442_vm4, %v44_v63 }
  0x34   :  { %2724 = vmatmul.mubr.msk.f32.gmra.mrb[6].mxu0 %vm442_vm4, %v45_v0  ;;  %v1202_v0 = vld [vmem:[%s4468_s7 + $0x10] sm:$0xf] }
  0x35   :  { %2726 = vmatprep.mubr.msk.f32.mxu0 %vm442_vm4, %v46_v1 }
  0x38   :  { %2727 = vmatmul.mubr.msk.f32.gmra.mrb[8].mxu0 %vm442_vm4, %v47_v3 }
  0x39   :  { %2729 = vmatprep.mubr.msk.f32.mxu0 %vm442_vm4, %v48_v4 }
  0x3c   :  { %2730 = vmatmul.mubr.msk.f32.gmra.mrb[10].mxu0 %vm442_vm4, %v49_v5 }
  0x3d   :  { %2732 = vmatprep.mubr.msk.f32.mxu0 %vm442_vm4, %v50_v6 }
  0x40   :  { %2733 = vmatmul.mubr.msk.f32.gmra.mrb[12].mxu0 %vm442_vm4, %v51_v7 }
  0x41   :  { %2735 = vmatprep.mubr.msk.f32.mxu0 %vm442_vm4, %v52_v8 }
  0x44   :  { %2736 = vmatmul.mubr.msk.f32.gmra.mrb[14].mxu0 %vm442_vm4, %v53_v9 }
  0x45   :  { %2738 = vmatprep.mubr.msk.f32.mxu0 %vm442_vm4, %v54_v10 }
  0x48   :  { %2739 = vmatmul.mubr.msk.f32.gmra.mrb[16].mxu0 %vm442_vm4, %v55_v11 }
  0x49   :  { %2741 = vmatprep.mubr.msk.f32.mxu0 %vm442_vm4, %v56_v12 }
  0x4c   :  { %2742 = vmatmul.mubr.msk.f32.gmra.mrb[18].mxu0 %vm442_vm4, %v57_v13 }
  0x4d   :  { %2744 = vmatprep.mubr.msk.f32.mxu0 %vm442_vm4, %v58_v14 }
  0x50   :  { %2745 = vmatmul.mubr.msk.f32.gmra.mrb[20].mxu0 %vm442_vm4, %v59_v15 }
  0x51   :  { %2747 = vmatprep.mubr.msk.f32.mxu0 %vm442_vm4, %v60_v16 }
  0x54   :  { %2748 = vmatmul.mubr.msk.f32.gmra.mrb[22].mxu0 %vm442_vm4, %v61_v17 }
  0x55   :  { %2750 = vmatprep.mubr.msk.f32.mxu0 %vm442_vm4, %v62_v18 }
  0x58   :  { %2751 = vmatmul.mubr.msk.f32.gmra.mrb[24].mxu0 %vm442_vm4, %v63_v19 }
  0x59   :  { %2753 = vmatprep.mubr.msk.f32.mxu0 %vm442_vm4, %v64_v20 }
  0x5c   :  { %2754 = vmatmul.mubr.msk.f32.gmra.mrb[26].mxu0 %vm442_vm4, %v65_v21 }
  0x5d   :  { %2756 = vmatprep.mubr.msk.f32.mxu0 %vm442_vm4, %v66_v22 }
  0x60   :  { %2757 = vmatmul.mubr.msk.f32.gmra.mrb[28].mxu0 %vm442_vm4, %v67_v23 }
  0x61   :  { %2759 = vmatprep.mubr.msk.f32.mxu0 %vm442_vm4, %v68_v24 }
  0x64   :  { %2760 = vmatmul.mubr.msk.f32.gmra.mrb[30].mxu0 %vm442_vm4, %v69_v25 }
  0xde   :  { %v3708_v29 = vpop.f32.mrb[0].mxu1 }
  0xdf   :  { %v3710_v30 = vpop.f32.mrb[1].mxu1 }
  0xe2   :  { %v3712_v31 = vpop.f32.mrb[2].mxu1 }
  0xe3   :  { %v3714_v32 = vpop.f32.mrb[3].mxu1 }
  0xe6   :  { %v3716_v33 = vpop.f32.mrb[4].mxu1 }
  0xe7   :  { %v3718_v34 = vpop.f32.mrb[5].mxu1 }
  0xea   :  { %v3720_v35 = vpop.f32.mrb[6].mxu1 }
  0xeb   :  { %v3722_v36 = vpop.f32.mrb[7].mxu1 }
  0xee   :  { %v3724_v37 = vpop.f32.mrb[8].mxu1 }
  0xef   :  { %v3726_v38 = vpop.f32.mrb[9].mxu1 }
  0xf2   :  { %v3733_v40 = vpop.f32.mrb[10].mxu1 }
  0xf3   :  { %v3735_v42 = vpop.f32.mrb[11].mxu1 }
  0xf6   :  { %v3739_v46 = vpop.f32.mrb[12].mxu1 }
  0xf7   :  { %v3741_v48 = vpop.f32.mrb[13].mxu1 }
  0xfa   :  { %v3745_v52 = vpop.f32.mrb[14].mxu1 }
  0xfb   :  { %v2716_v41 = vpop.f32.mrb[0].mxu0  ;;  %v3747_v54 = vpop.f32.mrb[15].mxu1 }
  0xfc   :  { %v772_v43 = vadd.f32 %v2716_v41, %v3731_v39  ;;  %v605_v44 = vpop.f32.mrb[1].mxu0 }
  0xfd   :  { %v771_v45 = vadd.f32 %v3731_v39, %v605_v44 }
  0xff   :  { %3001 = vtanh.f32 %v771_v45  ;;  %v2719_v47 = vpop.f32.mrb[2].mxu0 }
 0x100   :  { %3003 = vtanh.f32 %v772_v43  ;;  %v774_v49 = vadd.f32 %v2719_v47, %v3731_v39  ;;  %v615_v50 = vpop.f32.mrb[3].mxu0 }
 0x101   :  { %v773_v51 = vadd.f32 %v3731_v39, %v615_v50 }
 0x103   :  { %3005 = vtanh.f32 %v773_v51  ;;  %v2722_v53 = vpop.f32.mrb[4].mxu0 }
 0x104   :  { %3007 = vtanh.f32 %v774_v49  ;;  %v776_v55 = vadd.f32 %v2722_v53, %v3731_v39  ;;  %v625_v56 = vpop.f32.mrb[5].mxu0 }
 0x105   :  { %v775_v57 = vadd.f32 %v3731_v39, %v625_v56 }
 0x107   :  { %3009 = vtanh.f32 %v775_v57  ;;  %v2725_v58 = vpop.f32.mrb[6].mxu0 }
 0x108   :  { %3011 = vtanh.f32 %v776_v55  ;;  %v778_v59 = vadd.f32 %v2725_v58, %v3731_v39  ;;  %v635_v60 = vpop.f32.mrb[7].mxu0 }
 0x109   :  { %v3002_v61 = vpop.eup %3001  ;;  %v777_v62 = vadd.f32 %v3731_v39, %v635_v60 }
 0x10a   :  { %v3004_v63 = vpop.eup %3003  ;;  %2766 = vmatprep.mubr.msk.f32.mxu1 %vm116_vm1, %v3002_v61 }
 0x10b   :  { %3013 = vtanh.f32 %v777_v62  ;;  %v2728_v1 = vpop.f32.mrb[8].mxu0  ;;  %2767 = vmatmul.mubr.msk.f32.vlgmr.msra.gmra.mrb[16].mxu1 %vm116_vm1, %v3004_v63 }
 0x10c   :  { %3015 = vtanh.f32 %v778_v59  ;;  %v780_v3 = vadd.f32 %v2728_v1, %v3731_v39  ;;  %v645_v4 = vpop.f32.mrb[9].mxu0  ;;  %2959 = vmatpush3.bf16.msra.mxu1 %v2956_v28 }
 0x10d   :  { %v3006_v5 = vpop.eup %3005  ;;  %v779_v6 = vadd.f32 %v3731_v39, %v645_v4  ;;  %2818 = vmatprep.subr.msk.mxu1 %vm1307_vm5, %v1202_v0 }
 0x10e   :  { %v3008_v7 = vpop.eup %3007  ;;  %2769 = vmatprep.mubr.msk.f32.mxu1 %vm116_vm1, %v3006_v5 }
 0x10f   :  { %3017 = vtanh.f32 %v779_v6  ;;  %v2731_v8 = vpop.f32.mrb[10].mxu0  ;;  %2770 = vmatmul.mubr.msk.f32.gmra.mrb[18].mxu1 %vm116_vm1, %v3008_v7 }
 0x110   :  { %3019 = vtanh.f32 %v780_v3  ;;  %v782_v9 = vadd.f32 %v2731_v8, %v3731_v39  ;;  %v655_v10 = vpop.f32.mrb[11].mxu0  ;;  %2819 = vmatpush3.msk.msra.mxu1 %vm1307_vm5, %v1202_v0 }
 0x111   :  { %v3010_v11 = vpop.eup %3009  ;;  %v781_v12 = vadd.f32 %v3731_v39, %v655_v10 }
 0x112   :  { %v3012_v13 = vpop.eup %3011  ;;  %2772 = vmatprep.mubr.msk.f32.mxu1 %vm116_vm1, %v3010_v11 }
 0x113   :  { %3021 = vtanh.f32 %v781_v12  ;;  %v2734_v14 = vpop.f32.mrb[12].mxu0  ;;  %2773 = vmatmul.mubr.msk.f32.gmra.mrb[20].mxu1 %vm116_vm1, %v3012_v13 }
 0x114   :  { %3023 = vtanh.f32 %v782_v9  ;;  %v784_v15 = vadd.f32 %v2734_v14, %v3731_v39  ;;  %v665_v16 = vpop.f32.mrb[13].mxu0 }
 0x115   :  { %v3014_v17 = vpop.eup %3013  ;;  %v783_v18 = vadd.f32 %v3731_v39, %v665_v16 }
 0x116   :  { %v3016_v19 = vpop.eup %3015  ;;  %2775 = vmatprep.mubr.msk.f32.mxu1 %vm116_vm1, %v3014_v17 }
 0x117   :  { %3025 = vtanh.f32 %v783_v18  ;;  %v2737_v20 = vpop.f32.mrb[14].mxu0  ;;  %2776 = vmatmul.mubr.msk.f32.gmra.mrb[22].mxu1 %vm116_vm1, %v3016_v19 }
 0x118   :  { %3027 = vtanh.f32 %v784_v15  ;;  %v786_v21 = vadd.f32 %v2737_v20, %v3731_v39  ;;  %v675_v22 = vpop.f32.mrb[15].mxu0 }
 0x119   :  { %v3018_v23 = vpop.eup %3017  ;;  %v785_v24 = vadd.f32 %v3731_v39, %v675_v22 }
 0x11a   :  { %v3020_v25 = vpop.eup %3019  ;;  %2778 = vmatprep.mubr.msk.f32.mxu1 %vm116_vm1, %v3018_v23 }
 0x11b   :  { %3029 = vtanh.f32 %v785_v24  ;;  %v2740_v26 = vpop.f32.mrb[16].mxu0  ;;  %2779 = vmatmul.mubr.msk.f32.gmra.mrb[24].mxu1 %vm116_vm1, %v3020_v25 }
 0x11c   :  { %3031 = vtanh.f32 %v786_v21  ;;  %v691_v27 = vadd.f32 %v2740_v26, %v3708_v29  ;;  %v685_v28 = vpop.f32.mrb[17].mxu0 }
 0x11d   :  { %v3022_v41 = vpop.eup %3021  ;;  %v686_v43 = vadd.f32 %v685_v28, %v3710_v30 }
 0x11e   :  { %v3024_v44 = vpop.eup %3023  ;;  %v788_v45 = vadd.f32 %v3731_v39, %v691_v27  ;;  %2781 = vmatprep.mubr.msk.f32.mxu1 %vm116_vm1, %v3022_v41 }
 0x11f   :  { %v787_v47 = vadd.f32 %v3731_v39, %v686_v43  ;;  %v2743_v49 = vpop.f32.mrb[18].mxu0  ;;  %2782 = vmatmul.mubr.msk.f32.gmra.mrb[26].mxu1 %vm116_vm1, %v3024_v44 }
 0x120   :  { %3033 = vtanh.f32 %v788_v45  ;;  %v701_v50 = vadd.f32 %v2743_v49, %v3712_v31  ;;  %v695_v51 = vpop.f32.mrb[19].mxu0  ;;  %v1569_v49 = vld [vmem:[%s4470_s9 + $0x8] sm:$0x3] }
 0x121   :  { %v3026_v53 = vpop.eup %3025  ;;  %3035 = vtanh.f32 %v787_v47  ;;  %v696_v29 = vadd.f32 %v695_v51, %v3714_v32  ;;  %v1568_v47 = vld [vmem:[%s4470_s9] sm:$0xff] }
 0x122   :  { %v3028_v55 = vpop.eup %3027  ;;  %v790_v30 = vadd.f32 %v3731_v39, %v701_v50  ;;  %2784 = vmatprep.mubr.msk.f32.mxu1 %vm116_vm1, %v3026_v53  ;;  %v2960_v50 = vpack.c.bf16 %v1569_v49, %v1568_v47  ;;  %v3843_v51 = vld [vmem:[%s4471_s6] ss:$0 sm:$0xff] }
 0x123   :  { %v789_v56 = vadd.f32 %v3731_v39, %v696_v29  ;;  %v2746_v57 = vpop.f32.mrb[20].mxu0  ;;  %2785 = vmatmul.mubr.msk.f32.gmra.mrb[28].mxu1 %vm116_vm1, %v3028_v55 }
 0x124   :  { %3037 = vtanh.f32 %v790_v30  ;;  %v711_v58 = vadd.f32 %v2746_v57, %v3716_v33  ;;  %v705_v59 = vpop.f32.mrb[21].mxu0  ;;  %2962 = vmatprep.subr.msk.bf16.mxu0 %vm3388_vm3, %v2960_v50 }
 0x125   :  { %v3030_v31 = vpop.eup %3029  ;;  %3039 = vtanh.f32 %v789_v56  ;;  %v706_v60 = vadd.f32 %v705_v59, %v3718_v34  ;;  %2965 = vmatpush3.bf16.msk.msra.mxu0 %vm3388_vm3, %v2960_v50 }
 0x126   :  { %v3032_v61 = vpop.eup %3031  ;;  %v792_v32 = vadd.f32 %v3731_v39, %v711_v58  ;;  %2787 = vmatprep.mubr.msk.f32.mxu1 %vm116_vm1, %v3030_v31 }
 0x127   :  { %v791_v62 = vadd.f32 %v3731_v39, %v706_v60  ;;  %v2749_v63 = vpop.f32.mrb[22].mxu0  ;;  %2788 = vmatmul.mubr.msk.f32.gmra.mrb[30].mxu1 %vm116_vm1, %v3032_v61 }
 0x128   :  { %3041 = vtanh.f32 %v792_v32  ;;  %v721_v0 = vadd.f32 %v2749_v63, %v3720_v35  ;;  %v715_v1 = vpop.f32.mrb[23].mxu0 }
 0x129   :  { %3043 = vtanh.f32 %v791_v62  ;;  %v716_v33 = vadd.f32 %v715_v1, %v3722_v36 }
 0x12a   :  { %v3034_v3 = vpop.eup %3033  ;;  %v794_v34 = vadd.f32 %v3731_v39, %v721_v0 }
 0x12b   :  { %v3036_v4 = vpop.eup %3035  ;;  %v793_v5 = vadd.f32 %v3731_v39, %v716_v33  ;;  %v2752_v6 = vpop.f32.mrb[24].mxu0 }
 0x12c   :  { %3045 = vtanh.f32 %v794_v34  ;;  %v731_v7 = vadd.f32 %v2752_v6, %v3724_v37  ;;  %v725_v8 = vpop.f32.mrb[25].mxu0  ;;  %2790 = vmatprep.mubr.msk.f32.mxu1 %vm116_vm1, %v3036_v4 }
 0x12d   :  { %3047 = vtanh.f32 %v793_v5  ;;  %v726_v35 = vadd.f32 %v725_v8, %v3726_v38  ;;  %2791 = vmatmul.mubr.msk.f32.gmra.mrb[32].mxu1 %vm116_vm1, %v3034_v3 }
 0x12e   :  { %v3038_v9 = vpop.eup %3037  ;;  %v796_v36 = vadd.f32 %v3731_v39, %v731_v7 }
 0x12f   :  { %v3040_v10 = vpop.eup %3039  ;;  %v795_v11 = vadd.f32 %v3731_v39, %v726_v35  ;;  %v2755_v12 = vpop.f32.mrb[26].mxu0 }
 0x130   :  { %3049 = vtanh.f32 %v796_v36  ;;  %v741_v13 = vadd.f32 %v2755_v12, %v3733_v40  ;;  %v735_v14 = vpop.f32.mrb[27].mxu0  ;;  %2793 = vmatprep.mubr.msk.f32.mxu1 %vm116_vm1, %v3040_v10 }
 0x131   :  { %3051 = vtanh.f32 %v795_v11  ;;  %v736_v37 = vadd.f32 %v735_v14, %v3735_v42  ;;  %2794 = vmatmul.mubr.msk.f32.gmra.mrb[34].mxu1 %vm116_vm1, %v3038_v9 }
 0x132   :  { %v3042_v38 = vpop.eup %3041  ;;  %v798_v15 = vadd.f32 %v3731_v39, %v741_v13 }
 0x133   :  { %v3044_v16 = vpop.eup %3043  ;;  %v797_v17 = vadd.f32 %v3731_v39, %v736_v37  ;;  %v2758_v18 = vpop.f32.mrb[28].mxu0 }
 0x134   :  { %3053 = vtanh.f32 %v798_v15  ;;  %v751_v19 = vadd.f32 %v2758_v18, %v3739_v46  ;;  %v745_v20 = vpop.f32.mrb[29].mxu0  ;;  %2796 = vmatprep.mubr.msk.f32.mxu1 %vm116_vm1, %v3044_v16 }
 0x135   :  { %3055 = vtanh.f32 %v797_v17  ;;  %v746_v40 = vadd.f32 %v745_v20, %v3741_v48  ;;  %2797 = vmatmul.mubr.msk.f32.gmra.mrb[36].mxu1 %vm116_vm1, %v3042_v38 }
 0x136   :  { %v3046_v42 = vpop.eup %3045  ;;  %v800_v21 = vadd.f32 %v3731_v39, %v751_v19 }
 0x137   :  { %v3048_v22 = vpop.eup %3047  ;;  %v799_v23 = vadd.f32 %v3731_v39, %v746_v40  ;;  %v2761_v24 = vpop.f32.mrb[30].mxu0 }
 0x138   :  { %3057 = vtanh.f32 %v800_v21  ;;  %v761_v25 = vadd.f32 %v2761_v24, %v3745_v52  ;;  %v755_v26 = vpop.f32.mrb[31].mxu0  ;;  %2799 = vmatprep.mubr.msk.f32.mxu1 %vm116_vm1, %v3048_v22 }
 0x139   :  { %3059 = vtanh.f32 %v799_v23  ;;  %v756_v46 = vadd.f32 %v755_v26, %v3747_v54  ;;  %2800 = vmatmul.mubr.msk.f32.gmra.mrb[38].mxu1 %vm116_vm1, %v3046_v42 }
 0x13a   :  { %v3050_v48 = vpop.eup %3049  ;;  %v802_v27 = vadd.f32 %v3731_v39, %v761_v25 }
 0x13b   :  { %v3052_v28 = vpop.eup %3051  ;;  %v801_v41 = vadd.f32 %v3731_v39, %v756_v46 }
 0x13c   :  { %3061 = vtanh.f32 %v802_v27  ;;  %2802 = vmatprep.mubr.msk.f32.mxu1 %vm116_vm1, %v3052_v28 }
 0x13d   :  { %3063 = vtanh.f32 %v801_v41  ;;  %2803 = vmatmul.mubr.msk.f32.gmra.mrb[40].mxu1 %vm116_vm1, %v3050_v48 }
 0x13e   :  { %v3054_v52 = vpop.eup %3053 }
 0x13f   :  { %v3056_v43 = vpop.eup %3055 }
 0x140   :  { %2805 = vmatprep.mubr.msk.f32.mxu1 %vm116_vm1, %v3056_v43 }
 0x141   :  { %2806 = vmatmul.mubr.msk.f32.gmra.mrb[42].mxu1 %vm116_vm1, %v3054_v52 }
 0x142   :  { %v3058_v54 = vpop.eup %3057 }
 0x143   :  { %v3060_v44 = vpop.eup %3059 }
 0x144   :  { %2808 = vmatprep.mubr.msk.f32.mxu1 %vm116_vm1, %v3060_v44 }
 0x145   :  { %2809 = vmatmul.mubr.msk.f32.gmra.mrb[44].mxu1 %vm116_vm1, %v3058_v54 }
 0x146   :  { %v3062_v45 = vpop.eup %3061 }
 0x147   :  { %v3064_v39 = vpop.eup %3063 }
 0x148   :  { %2811 = vmatprep.mubr.msk.f32.mxu1 %vm116_vm1, %v3064_v39 }
 0x149   :  { %2812 = vmatmul.mubr.msk.f32.gmra.mrb[46].mxu1 %vm116_vm1, %v3062_v45 }
 0x1de   :  { %v2768_v53 = vpop.f32.mrb[16].mxu1 }
 0x1df   :  { %v1015_v29 = vadd.f32 %v2768_v53, %v3843_v51  ;;  %v1009_v55 = vpop.f32.mrb[17].mxu1 }
 0x1e0   :  { %v1010_v30 = vadd.f32 %v3843_v51, %v1009_v55 }
 0x1e2   :  { %3065 = vtanh.f32 %v1010_v30  ;;  %v2771_v56 = vpop.f32.mrb[18].mxu1 }
 0x1e3   :  { %3067 = vtanh.f32 %v1015_v29  ;;  %v1025_v57 = vadd.f32 %v2771_v56, %v3843_v51  ;;  %v1019_v58 = vpop.f32.mrb[19].mxu1 }
 0x1e4   :  { %v1020_v2 = vadd.f32 %v3843_v51, %v1019_v58 }
 0x1e6   :  { %3069 = vtanh.f32 %v1020_v2  ;;  %v2774_v59 = vpop.f32.mrb[20].mxu1 }
 0x1e7   :  { %3071 = vtanh.f32 %v1025_v57  ;;  %v1035_v31 = vadd.f32 %v2774_v59, %v3843_v51  ;;  %v1029_v60 = vpop.f32.mrb[21].mxu1 }
 0x1e8   :  { %v1030_v61 = vadd.f32 %v3843_v51, %v1029_v60 }
 0x1ea   :  { %3073 = vtanh.f32 %v1030_v61  ;;  %v2777_v32 = vpop.f32.mrb[22].mxu1 }
 0x1eb   :  { %3075 = vtanh.f32 %v1035_v31  ;;  %v1045_v62 = vadd.f32 %v2777_v32, %v3843_v51  ;;  %v1039_v63 = vpop.f32.mrb[23].mxu1 }
 0x1ec   :  { %v3066_v0 = vpop.eup %3065  ;;  %v1040_v1 = vadd.f32 %v3843_v51, %v1039_v63 }
 0x1ed   :  { %v3068_v33 = vpop.eup %3067  ;;  %2820 = vmatprep.mubr.msk.f32.mxu1 %vm1210_vm6, %v3066_v0 }
 0x1ee   :  { %3077 = vtanh.f32 %v1040_v1  ;;  %v2780_v3 = vpop.f32.mrb[24].mxu1  ;;  %2821 = vmatmul.mubr.msk.f32.vlgmr.msra.gmra.mrb[48].mxu1 %vm1210_vm6, %v3068_v33 }
 0x1ef   :  { %3079 = vtanh.f32 %v1045_v62  ;;  %v1055_v34 = vadd.f32 %v2780_v3, %v3843_v51  ;;  %v1049_v4 = vpop.f32.mrb[25].mxu1 }
 0x1f0   :  { %v3070_v5 = vpop.eup %3069  ;;  %v1050_v6 = vadd.f32 %v3843_v51, %v1049_v4 }
 0x1f1   :  { %v3072_v7 = vpop.eup %3071  ;;  %2823 = vmatprep.mubr.msk.f32.mxu1 %vm1210_vm6, %v3070_v5 }
 0x1f2   :  { %3081 = vtanh.f32 %v1050_v6  ;;  %v2783_v8 = vpop.f32.mrb[26].mxu1  ;;  %2824 = vmatmul.mubr.msk.f32.gmra.mrb[50].mxu1 %vm1210_vm6, %v3072_v7 }
 0x1f3   :  { %3083 = vtanh.f32 %v1055_v34  ;;  %v1065_v35 = vadd.f32 %v2783_v8, %v3843_v51  ;;  %v1059_v9 = vpop.f32.mrb[27].mxu1 }
 0x1f4   :  { %v3074_v36 = vpop.eup %3073  ;;  %v1060_v10 = vadd.f32 %v3843_v51, %v1059_v9 }
 0x1f5   :  { %v3076_v11 = vpop.eup %3075  ;;  %2826 = vmatprep.mubr.msk.f32.mxu1 %vm1210_vm6, %v3074_v36 }
 0x1f6   :  { %3085 = vtanh.f32 %v1060_v10  ;;  %v2786_v12 = vpop.f32.mrb[28].mxu1  ;;  %2827 = vmatmul.mubr.msk.f32.gmra.mrb[52].mxu1 %vm1210_vm6, %v3076_v11 }
 0x1f7   :  { %3087 = vtanh.f32 %v1065_v35  ;;  %v1075_v13 = vadd.f32 %v2786_v12, %v3843_v51  ;;  %v1069_v14 = vpop.f32.mrb[29].mxu1 }
 0x1f8   :  { %v3078_v37 = vpop.eup %3077  ;;  %v1070_v38 = vadd.f32 %v3843_v51, %v1069_v14  ;;  %v3912_v14 = vld [vmem:[%s4472_s8] ss:$0 sm:$0xff] }
 0x1f9   :  { %v3080_v15 = vpop.eup %3079  ;;  %2829 = vmatprep.mubr.msk.f32.mxu1 %vm1210_vm6, %v3078_v37 }
 0x1fa   :  { %3089 = vtanh.f32 %v1070_v38  ;;  %v2789_v16 = vpop.f32.mrb[30].mxu1  ;;  %2830 = vmatmul.mubr.msk.f32.gmra.mrb[54].mxu1 %vm1210_vm6, %v3080_v15 }
 0x1fb   :  { %3091 = vtanh.f32 %v1075_v13  ;;  %v1085_v17 = vadd.f32 %v2789_v16, %v3843_v51  ;;  %v1079_v18 = vpop.f32.mrb[31].mxu1 }
 0x1fc   :  { %v3082_v19 = vpop.eup %3081  ;;  %v1080_v20 = vadd.f32 %v3843_v51, %v1079_v18 }
 0x1fd   :  { %v3084_v40 = vpop.eup %3083  ;;  %2832 = vmatprep.mubr.msk.f32.mxu1 %vm1210_vm6, %v3082_v19 }
 0x1fe   :  { %3093 = vtanh.f32 %v1080_v20  ;;  %2833 = vmatmul.mubr.msk.f32.gmra.mrb[56].mxu1 %vm1210_vm6, %v3084_v40 }
 0x1ff   :  { %3095 = vtanh.f32 %v1085_v17 }
 0x200   :  { %v3086_v42 = vpop.eup %3085  ;;  %v2792_v21 = vpop.f32.mrb[32].mxu1 }
 0x201   :  { %v3088_v22 = vpop.eup %3087  ;;  %v1095_v23 = vadd.f32 %v2792_v21, %v3843_v51  ;;  %v1089_v24 = vpop.f32.mrb[33].mxu1  ;;  %2835 = vmatprep.mubr.msk.f32.mxu1 %vm1210_vm6, %v3086_v42 }
 0x202   :  { %v1090_v25 = vadd.f32 %v3843_v51, %v1089_v24  ;;  %2836 = vmatmul.mubr.msk.f32.gmra.mrb[58].mxu1 %vm1210_vm6, %v3088_v22 }
 0x204   :  { %v3090_v26 = vpop.eup %3089  ;;  %3097 = vtanh.f32 %v1090_v25  ;;  %v2795_v46 = vpop.f32.mrb[34].mxu1 }
 0x205   :  { %v3092_v48 = vpop.eup %3091  ;;  %3099 = vtanh.f32 %v1095_v23  ;;  %v1105_v27 = vadd.f32 %v2795_v46, %v3843_v51  ;;  %v1099_v28 = vpop.f32.mrb[35].mxu1  ;;  %2838 = vmatprep.mubr.msk.f32.mxu1 %vm1210_vm6, %v3090_v26 }
 0x206   :  { %v1100_v41 = vadd.f32 %v3843_v51, %v1099_v28  ;;  %2839 = vmatmul.mubr.msk.f32.gmra.mrb[60].mxu1 %vm1210_vm6, %v3092_v48 }
 0x208   :  { %v3094_v52 = vpop.eup %3093  ;;  %3101 = vtanh.f32 %v1100_v41  ;;  %v2798_v43 = vpop.f32.mrb[36].mxu1 }
 0x209   :  { %v3096_v54 = vpop.eup %3095  ;;  %3103 = vtanh.f32 %v1105_v27  ;;  %v1115_v44 = vadd.f32 %v2798_v43, %v3843_v51  ;;  %v1109_v45 = vpop.f32.mrb[37].mxu1  ;;  %2841 = vmatprep.mubr.msk.f32.mxu1 %vm1210_vm6, %v3094_v52 }
 0x20a   :  { %v1110_v39 = vadd.f32 %v3843_v51, %v1109_v45  ;;  %2842 = vmatmul.mubr.msk.f32.gmra.mrb[62].mxu1 %vm1210_vm6, %v3096_v54 }
 0x20c   :  { %3105 = vtanh.f32 %v1110_v39  ;;  %v2801_v47 = vpop.f32.mrb[38].mxu1 }
 0x20d   :  { %3107 = vtanh.f32 %v1115_v44  ;;  %v1125_v49 = vadd.f32 %v2801_v47, %v3843_v51  ;;  %v1119_v50 = vpop.f32.mrb[39].mxu1 }
 0x20e   :  { %v3098_v53 = vpop.eup %3097  ;;  %v1120_v29 = vadd.f32 %v3843_v51, %v1119_v50 }
 0x20f   :  { %v3100_v55 = vpop.eup %3099  ;;  %2844 = vmatprep.mubr.msk.f32.mxu1 %vm1210_vm6, %v3098_v53 }
 0x210   :  { %3109 = vtanh.f32 %v1120_v29  ;;  %v2804_v30 = vpop.f32.mrb[40].mxu1  ;;  %2845 = vmatmul.mubr.msk.f32.gmra.mrb[64].mxu1 %vm1210_vm6, %v3100_v55 }
 0x211   :  { %3111 = vtanh.f32 %v1125_v49  ;;  %v1135_v56 = vadd.f32 %v2804_v30, %v3843_v51  ;;  %v1129_v57 = vpop.f32.mrb[41].mxu1 }
 0x212   :  { %v3102_v58 = vpop.eup %3101  ;;  %v1130_v2 = vadd.f32 %v3843_v51, %v1129_v57 }
 0x213   :  { %v3104_v59 = vpop.eup %3103  ;;  %2847 = vmatprep.mubr.msk.f32.mxu1 %vm1210_vm6, %v3102_v58 }
 0x214   :  { %3113 = vtanh.f32 %v1130_v2  ;;  %v2807_v31 = vpop.f32.mrb[42].mxu1  ;;  %2848 = vmatmul.mubr.msk.f32.gmra.mrb[66].mxu1 %vm1210_vm6, %v3104_v59 }
 0x215   :  { %3115 = vtanh.f32 %v1135_v56  ;;  %v1145_v60 = vadd.f32 %v2807_v31, %v3843_v51  ;;  %v1139_v61 = vpop.f32.mrb[43].mxu1 }
 0x216   :  { %v3106_v32 = vpop.eup %3105  ;;  %v1140_v62 = vadd.f32 %v3843_v51, %v1139_v61 }
 0x217   :  { %v3108_v63 = vpop.eup %3107  ;;  %2850 = vmatprep.mubr.msk.f32.mxu1 %vm1210_vm6, %v3106_v32 }
 0x218   :  { %3117 = vtanh.f32 %v1140_v62  ;;  %v2810_v0 = vpop.f32.mrb[44].mxu1  ;;  %2851 = vmatmul.mubr.msk.f32.gmra.mrb[68].mxu1 %vm1210_vm6, %v3108_v63 }
 0x219   :  { %3119 = vtanh.f32 %v1145_v60  ;;  %v1155_v1 = vadd.f32 %v2810_v0, %v3843_v51  ;;  %v1149_v33 = vpop.f32.mrb[45].mxu1 }
 0x21a   :  { %v3110_v3 = vpop.eup %3109  ;;  %v1150_v34 = vadd.f32 %v3843_v51, %v1149_v33 }
 0x21b   :  { %v3112_v4 = vpop.eup %3111  ;;  %2853 = vmatprep.mubr.msk.f32.mxu1 %vm1210_vm6, %v3110_v3 }
 0x21c   :  { %3121 = vtanh.f32 %v1150_v34  ;;  %v2813_v5 = vpop.f32.mrb[46].mxu1  ;;  %2854 = vmatmul.mubr.msk.f32.gmra.mrb[70].mxu1 %vm1210_vm6, %v3112_v4 }
 0x21d   :  { %3123 = vtanh.f32 %v1155_v1  ;;  %v1165_v6 = vadd.f32 %v2813_v5, %v3843_v51  ;;  %v1159_v7 = vpop.f32.mrb[47].mxu1 }
 0x21e   :  { %v3114_v8 = vpop.eup %3113  ;;  %v1160_v35 = vadd.f32 %v3843_v51, %v1159_v7 }
 0x21f   :  { %v3116_v9 = vpop.eup %3115  ;;  %2856 = vmatprep.mubr.msk.f32.mxu1 %vm1210_vm6, %v3114_v8 }
 0x220   :  { %3125 = vtanh.f32 %v1160_v35  ;;  %2857 = vmatmul.mubr.msk.f32.gmra.mrb[72].mxu1 %vm1210_vm6, %v3116_v9 }
 0x221   :  { %3127 = vtanh.f32 %v1165_v6 }
 0x222   :  { %v3118_v36 = vpop.eup %3117 }
 0x223   :  { %v3120_v10 = vpop.eup %3119  ;;  %2859 = vmatprep.mubr.msk.f32.mxu1 %vm1210_vm6, %v3118_v36 }
 0x224   :  { %2860 = vmatmul.mubr.msk.f32.gmra.mrb[74].mxu1 %vm1210_vm6, %v3120_v10 }
 0x226   :  { %v3122_v11 = vpop.eup %3121 }
 0x227   :  { %v3124_v12 = vpop.eup %3123  ;;  %2862 = vmatprep.mubr.msk.f32.mxu1 %vm1210_vm6, %v3122_v11 }
 0x228   :  { %2863 = vmatmul.mubr.msk.f32.gmra.mrb[76].mxu1 %vm1210_vm6, %v3124_v12 }
 0x22a   :  { %v3126_v51 = vpop.eup %3125 }
 0x22b   :  { %v3128_v13 = vpop.eup %3127  ;;  %2865 = vmatprep.mubr.msk.f32.mxu1 %vm1210_vm6, %v3126_v51 }
 0x22c   :  { %2866 = vmatmul.mubr.msk.f32.gmra.mrb[78].mxu1 %vm1210_vm6, %v3128_v13 }
 0x2c1   :  { %v2822_v37 = vpop.f32.mrb[48].mxu1 }
 0x2c2   :  { %v1383_v38 = vadd.f32 %v2822_v37, %v3912_v14  ;;  %v1377_v15 = vpop.f32.mrb[49].mxu1 }
 0x2c3   :  { %v1378_v16 = vadd.f32 %v3912_v14, %v1377_v15 }
 0x2c5   :  { %3129 = vtanh.f32 %v1378_v16  ;;  %v2825_v17 = vpop.f32.mrb[50].mxu1 }
 0x2c6   :  { %3131 = vtanh.f32 %v1383_v38  ;;  %v1393_v18 = vadd.f32 %v2825_v17, %v3912_v14  ;;  %v1387_v19 = vpop.f32.mrb[51].mxu1 }
 0x2c7   :  { %v1388_v20 = vadd.f32 %v3912_v14, %v1387_v19 }
 0x2c9   :  { %3133 = vtanh.f32 %v1388_v20  ;;  %v2828_v40 = vpop.f32.mrb[52].mxu1 }
 0x2ca   :  { %3135 = vtanh.f32 %v1393_v18  ;;  %v1403_v42 = vadd.f32 %v2828_v40, %v3912_v14  ;;  %v1397_v21 = vpop.f32.mrb[53].mxu1 }
 0x2cb   :  { %v1398_v22 = vadd.f32 %v3912_v14, %v1397_v21 }
 0x2cd   :  { %3137 = vtanh.f32 %v1398_v22  ;;  %v2831_v23 = vpop.f32.mrb[54].mxu1 }
 0x2ce   :  { %3139 = vtanh.f32 %v1403_v42  ;;  %v1413_v24 = vadd.f32 %v2831_v23, %v3912_v14  ;;  %v1407_v25 = vpop.f32.mrb[55].mxu1 }
 0x2cf   :  { %v3130_v26 = vpop.eup %3129  ;;  %v1408_v46 = vadd.f32 %v3912_v14, %v1407_v25 }
 0x2d0   :  { %v3132_v48 = vpop.eup %3131  ;;  %2872 = vmatprep.mubr.msk.f32.mxu0 %vm116_vm1, %v3130_v26 }
 0x2d1   :  { %3141 = vtanh.f32 %v1408_v46  ;;  %v2834_v27 = vpop.f32.mrb[56].mxu1  ;;  %2873 = vmatmul.mubr.msk.f32.vlgmr.msra.gmra.mrb[32].mxu0 %vm116_vm1, %v3132_v48 }
 0x2d2   :  { %3143 = vtanh.f32 %v1413_v24  ;;  %v1423_v28 = vadd.f32 %v2834_v27, %v3912_v14  ;;  %v1417_v41 = vpop.f32.mrb[57].mxu1 }
 0x2d3   :  { %v3134_v52 = vpop.eup %3133  ;;  %v1418_v43 = vadd.f32 %v3912_v14, %v1417_v41 }
 0x2d4   :  { %v3136_v54 = vpop.eup %3135  ;;  %2875 = vmatprep.mubr.msk.f32.mxu0 %vm116_vm1, %v3134_v52 }
 0x2d5   :  { %3145 = vtanh.f32 %v1418_v43  ;;  %v2837_v44 = vpop.f32.mrb[58].mxu1  ;;  %2876 = vmatmul.mubr.msk.f32.gmra.mrb[34].mxu0 %vm116_vm1, %v3136_v54 }
 0x2d6   :  { %3147 = vtanh.f32 %v1423_v28  ;;  %v1433_v45 = vadd.f32 %v2837_v44, %v3912_v14  ;;  %v1427_v39 = vpop.f32.mrb[59].mxu1 }
 0x2d7   :  { %v3138_v47 = vpop.eup %3137  ;;  %v1428_v49 = vadd.f32 %v3912_v14, %v1427_v39 }
 0x2d8   :  { %v3140_v50 = vpop.eup %3139  ;;  %2878 = vmatprep.mubr.msk.f32.mxu0 %vm116_vm1, %v3138_v47 }
 0x2d9   :  { %3149 = vtanh.f32 %v1428_v49  ;;  %v2840_v53 = vpop.f32.mrb[60].mxu1  ;;  %2879 = vmatmul.mubr.msk.f32.gmra.mrb[36].mxu0 %vm116_vm1, %v3140_v50 }
 0x2da   :  { %3151 = vtanh.f32 %v1433_v45  ;;  %v1443_v29 = vadd.f32 %v2840_v53, %v3912_v14  ;;  %v1437_v55 = vpop.f32.mrb[61].mxu1 }
 0x2db   :  { %v3142_v30 = vpop.eup %3141  ;;  %v1438_v56 = vadd.f32 %v3912_v14, %v1437_v55  ;;  %v3981_v55 = vld [vmem:[%s4473_s10] ss:$0 sm:$0xff] }
 0x2dc   :  { %v3144_v57 = vpop.eup %3143  ;;  %2881 = vmatprep.mubr.msk.f32.mxu0 %vm116_vm1, %v3142_v30 }
 0x2dd   :  { %3153 = vtanh.f32 %v1438_v56  ;;  %v2843_v58 = vpop.f32.mrb[62].mxu1  ;;  %2882 = vmatmul.mubr.msk.f32.gmra.mrb[38].mxu0 %vm116_vm1, %v3144_v57 }
 0x2de   :  { %3155 = vtanh.f32 %v1443_v29  ;;  %v1453_v2 = vadd.f32 %v2843_v58, %v3912_v14  ;;  %v1447_v59 = vpop.f32.mrb[63].mxu1 }
 0x2df   :  { %v3146_v31 = vpop.eup %3145  ;;  %v1448_v60 = vadd.f32 %v3912_v14, %v1447_v59 }
 0x2e0   :  { %v3148_v61 = vpop.eup %3147  ;;  %2884 = vmatprep.mubr.msk.f32.mxu0 %vm116_vm1, %v3146_v31 }
 0x2e1   :  { %3157 = vtanh.f32 %v1448_v60  ;;  %2885 = vmatmul.mubr.msk.f32.gmra.mrb[40].mxu0 %vm116_vm1, %v3148_v61 }
 0x2e2   :  { %3159 = vtanh.f32 %v1453_v2 }
 0x2e3   :  { %v3150_v32 = vpop.eup %3149  ;;  %v2846_v62 = vpop.f32.mrb[64].mxu1 }
 0x2e4   :  { %v3152_v63 = vpop.eup %3151  ;;  %v1463_v0 = vadd.f32 %v2846_v62, %v3912_v14  ;;  %v1457_v1 = vpop.f32.mrb[65].mxu1  ;;  %2887 = vmatprep.mubr.msk.f32.mxu0 %vm116_vm1, %v3150_v32 }
 0x2e5   :  { %v1458_v33 = vadd.f32 %v3912_v14, %v1457_v1  ;;  %2888 = vmatmul.mubr.msk.f32.gmra.mrb[42].mxu0 %vm116_vm1, %v3152_v63 }
 0x2e7   :  { %v3154_v3 = vpop.eup %3153  ;;  %3161 = vtanh.f32 %v1458_v33  ;;  %v2849_v34 = vpop.f32.mrb[66].mxu1 }
 0x2e8   :  { %v3156_v4 = vpop.eup %3155  ;;  %3163 = vtanh.f32 %v1463_v0  ;;  %v1473_v5 = vadd.f32 %v2849_v34, %v3912_v14  ;;  %v1467_v6 = vpop.f32.mrb[67].mxu1  ;;  %2890 = vmatprep.mubr.msk.f32.mxu0 %vm116_vm1, %v3154_v3 }
 0x2e9   :  { %v1468_v7 = vadd.f32 %v3912_v14, %v1467_v6  ;;  %2891 = vmatmul.mubr.msk.f32.gmra.mrb[44].mxu0 %vm116_vm1, %v3156_v4 }
 0x2eb   :  { %v3158_v8 = vpop.eup %3157  ;;  %3165 = vtanh.f32 %v1468_v7  ;;  %v2852_v35 = vpop.f32.mrb[68].mxu1 }
 0x2ec   :  { %v3160_v9 = vpop.eup %3159  ;;  %3167 = vtanh.f32 %v1473_v5  ;;  %v1483_v36 = vadd.f32 %v2852_v35, %v3912_v14  ;;  %v1477_v10 = vpop.f32.mrb[69].mxu1  ;;  %2893 = vmatprep.mubr.msk.f32.mxu0 %vm116_vm1, %v3158_v8 }
 0x2ed   :  { %v1478_v11 = vadd.f32 %v3912_v14, %v1477_v10  ;;  %2894 = vmatmul.mubr.msk.f32.gmra.mrb[46].mxu0 %vm116_vm1, %v3160_v9 }
 0x2ef   :  { %3169 = vtanh.f32 %v1478_v11  ;;  %v2855_v12 = vpop.f32.mrb[70].mxu1 }
 0x2f0   :  { %3171 = vtanh.f32 %v1483_v36  ;;  %v1493_v51 = vadd.f32 %v2855_v12, %v3912_v14  ;;  %v1487_v13 = vpop.f32.mrb[71].mxu1 }
 0x2f1   :  { %v3162_v37 = vpop.eup %3161  ;;  %v1488_v38 = vadd.f32 %v3912_v14, %v1487_v13 }
 0x2f2   :  { %v3164_v15 = vpop.eup %3163  ;;  %2896 = vmatprep.mubr.msk.f32.mxu0 %vm116_vm1, %v3162_v37 }
 0x2f3   :  { %3173 = vtanh.f32 %v1488_v38  ;;  %v2858_v16 = vpop.f32.mrb[72].mxu1  ;;  %2897 = vmatmul.mubr.msk.f32.gmra.mrb[48].mxu0 %vm116_vm1, %v3164_v15 }
 0x2f4   :  { %3175 = vtanh.f32 %v1493_v51  ;;  %v1503_v17 = vadd.f32 %v2858_v16, %v3912_v14  ;;  %v1497_v18 = vpop.f32.mrb[73].mxu1 }
 0x2f5   :  { %v3166_v19 = vpop.eup %3165  ;;  %v1498_v20 = vadd.f32 %v3912_v14, %v1497_v18 }
 0x2f6   :  { %v3168_v40 = vpop.eup %3167  ;;  %2899 = vmatprep.mubr.msk.f32.mxu0 %vm116_vm1, %v3166_v19 }
 0x2f7   :  { %3177 = vtanh.f32 %v1498_v20  ;;  %v2861_v42 = vpop.f32.mrb[74].mxu1  ;;  %2900 = vmatmul.mubr.msk.f32.gmra.mrb[50].mxu0 %vm116_vm1, %v3168_v40 }
 0x2f8   :  { %3179 = vtanh.f32 %v1503_v17  ;;  %v1513_v21 = vadd.f32 %v2861_v42, %v3912_v14  ;;  %v1507_v22 = vpop.f32.mrb[75].mxu1 }
 0x2f9   :  { %v3170_v23 = vpop.eup %3169  ;;  %v1508_v24 = vadd.f32 %v3912_v14, %v1507_v22 }
 0x2fa   :  { %v3172_v25 = vpop.eup %3171  ;;  %2902 = vmatprep.mubr.msk.f32.mxu0 %vm116_vm1, %v3170_v23 }
 0x2fb   :  { %3181 = vtanh.f32 %v1508_v24  ;;  %v2864_v26 = vpop.f32.mrb[76].mxu1  ;;  %2903 = vmatmul.mubr.msk.f32.gmra.mrb[52].mxu0 %vm116_vm1, %v3172_v25 }
 0x2fc   :  { %3183 = vtanh.f32 %v1513_v21  ;;  %v1523_v46 = vadd.f32 %v2864_v26, %v3912_v14  ;;  %v1517_v48 = vpop.f32.mrb[77].mxu1 }
 0x2fd   :  { %v3174_v27 = vpop.eup %3173  ;;  %v1518_v28 = vadd.f32 %v3912_v14, %v1517_v48 }
 0x2fe   :  { %v3176_v41 = vpop.eup %3175  ;;  %2905 = vmatprep.mubr.msk.f32.mxu0 %vm116_vm1, %v3174_v27 }
 0x2ff   :  { %3185 = vtanh.f32 %v1518_v28  ;;  %v2867_v52 = vpop.f32.mrb[78].mxu1  ;;  %2906 = vmatmul.mubr.msk.f32.gmra.mrb[54].mxu0 %vm116_vm1, %v3176_v41 }
 0x300   :  { %3187 = vtanh.f32 %v1523_v46  ;;  %v1533_v43 = vadd.f32 %v2867_v52, %v3912_v14  ;;  %v1527_v54 = vpop.f32.mrb[79].mxu1 }
 0x301   :  { %v3178_v44 = vpop.eup %3177  ;;  %v1528_v45 = vadd.f32 %v3912_v14, %v1527_v54 }
 0x302   :  { %v3180_v39 = vpop.eup %3179  ;;  %2908 = vmatprep.mubr.msk.f32.mxu0 %vm116_vm1, %v3178_v44 }
 0x303   :  { %3189 = vtanh.f32 %v1528_v45  ;;  %2909 = vmatmul.mubr.msk.f32.gmra.mrb[56].mxu0 %vm116_vm1, %v3180_v39 }
 0x304   :  { %3191 = vtanh.f32 %v1533_v43 }
 0x305   :  { %v3182_v47 = vpop.eup %3181 }
 0x306   :  { %v3184_v49 = vpop.eup %3183  ;;  %2911 = vmatprep.mubr.msk.f32.mxu0 %vm116_vm1, %v3182_v47 }
 0x307   :  { %2912 = vmatmul.mubr.msk.f32.gmra.mrb[58].mxu0 %vm116_vm1, %v3184_v49 }
 0x309   :  { %v3186_v50 = vpop.eup %3185 }
 0x30a   :  { %v3188_v53 = vpop.eup %3187  ;;  %2914 = vmatprep.mubr.msk.f32.mxu0 %vm116_vm1, %v3186_v50 }
 0x30b   :  { %2915 = vmatmul.mubr.msk.f32.gmra.mrb[60].mxu0 %vm116_vm1, %v3188_v53 }
 0x30d   :  { %v3190_v14 = vpop.eup %3189 }
 0x30e   :  { %v3192_v29 = vpop.eup %3191  ;;  %2917 = vmatprep.mubr.msk.f32.mxu0 %vm116_vm1, %v3190_v14 }
 0x30f   :  { %2918 = vmatmul.mubr.msk.f32.gmra.mrb[62].mxu0 %vm116_vm1, %v3192_v29 }
 0x3a4   :  { %v2874_v30 = vpop.f32.mrb[32].mxu0 }
 0x3a5   :  { %v3984_v56 = vadd.f32 %v2874_v30, %v3981_v55  ;;  %v1742_v57 = vpop.f32.mrb[33].mxu0 }
 0x3a6   :  { %v3987_v58 = vadd.f32 %v3981_v55, %v1742_v57 }
 0x3a7   :  { %v1904_v2 = vsel %vm116_vm1, %v3984_v56, -inf }
 0x3a8   :  { %1905 = vmax.xlane.f32.xlu0 %v1904_v2  ;;  %v2877_v59 = vpop.f32.mrb[34].mxu0  ;;  %v1901_v62 = vsel %vm116_vm1, %v3987_v58, -inf }
 0x3a9   :  { %v3992_v31 = vadd.f32 %v2877_v59, %v3981_v55  ;;  %v1752_v60 = vpop.f32.mrb[35].mxu0 }
 0x3aa   :  { %v3995_v61 = vadd.f32 %v3981_v55, %v1752_v60 }
 0x3ab   :  { %v1910_v32 = vsel %vm116_vm1, %v3992_v31, -inf }
 0x3ac   :  { %1911 = vmax.xlane.f32.xlu1 %v1910_v32  ;;  %v2880_v63 = vpop.f32.mrb[36].mxu0  ;;  %1902 = vmax.xlane.f32.xlu0 %v1901_v62  ;;  %v1907_v3 = vsel %vm116_vm1, %v3995_v61, -inf }
 0x3ad   :  { %v1762_v0 = vpop.f32.mrb[37].mxu0  ;;  %v4005_v33 = vadd.f32 %v2880_v63, %v3981_v55 }
 0x3ae   :  { %v4002_v1 = vadd.f32 %v3981_v55, %v1762_v0 }
 0x3af   :  { %v1916_v8 = vsel %vm116_vm1, %v4005_v33, -inf }
 0x3b0   :  { %v2883_v34 = vpop.f32.mrb[38].mxu0  ;;  %1908 = vmax.xlane.f32.xlu1 %v1907_v3  ;;  %v1913_v4 = vsel %vm116_vm1, %v4002_v1, -inf }
 0x3b1   :  { %v1772_v5 = vpop.f32.mrb[39].mxu0  ;;  %1914 = vmax.xlane.f32.xlu0 %v1913_v4  ;;  %v4015_v7 = vadd.f32 %v2883_v34, %v3981_v55 }
 0x3b2   :  { %v4012_v6 = vadd.f32 %v3981_v55, %v1772_v5 }
 0x3b3   :  { %v1922_v12 = vsel %vm116_vm1, %v4015_v7, -inf }
 0x3b4   :  { %v2886_v35 = vpop.f32.mrb[40].mxu0  ;;  %1917 = vmax.xlane.f32.xlu1 %v1916_v8  ;;  %v1919_v9 = vsel %vm116_vm1, %v4012_v6, -inf }
 0x3b5   :  { %v1782_v36 = vpop.f32.mrb[41].mxu0  ;;  %1920 = vmax.xlane.f32.xlu0 %v1919_v9  ;;  %v4025_v11 = vadd.f32 %v2886_v35, %v3981_v55 }
 0x3b6   :  { %v4022_v10 = vadd.f32 %v3981_v55, %v1782_v36 }
 0x3b7   :  { %v1928_v16 = vsel %vm116_vm1, %v4025_v11, -inf }
 0x3b8   :  { %v2889_v51 = vpop.f32.mrb[42].mxu0  ;;  %1923 = vmax.xlane.f32.xlu1 %v1922_v12  ;;  %v1925_v13 = vsel %vm116_vm1, %v4022_v10, -inf }
 0x3b9   :  { %v1792_v37 = vpop.f32.mrb[43].mxu0  ;;  %1926 = vmax.xlane.f32.xlu0 %v1925_v13  ;;  %v4035_v15 = vadd.f32 %v2889_v51, %v3981_v55 }
 0x3ba   :  { %v4032_v38 = vadd.f32 %v3981_v55, %v1792_v37 }
 0x3bb   :  { %v1934_v42 = vsel %vm116_vm1, %v4035_v15, -inf }
 0x3bc   :  { %v2892_v17 = vpop.f32.mrb[44].mxu0  ;;  %1929 = vmax.xlane.f32.xlu1 %v1928_v16  ;;  %v1931_v18 = vsel %vm116_vm1, %v4032_v38, -inf }
 0x3bd   :  { %v1802_v19 = vpop.f32.mrb[45].mxu0  ;;  %1932 = vmax.xlane.f32.xlu0 %v1931_v18  ;;  %v4045_v40 = vadd.f32 %v2892_v17, %v3981_v55 }
 0x3be   :  { %v4042_v20 = vadd.f32 %v3981_v55, %v1802_v19 }
 0x3bf   :  { %v1940_v26 = vsel %vm116_vm1, %v4045_v40, -inf }
 0x3c0   :  { %v2895_v21 = vpop.f32.mrb[46].mxu0  ;;  %1935 = vmax.xlane.f32.xlu1 %v1934_v42  ;;  %v1937_v22 = vsel %vm116_vm1, %v4042_v20, -inf }
 0x3c1   :  { %v1812_v23 = vpop.f32.mrb[47].mxu0  ;;  %1938 = vmax.xlane.f32.xlu0 %v1937_v22  ;;  %v4055_v25 = vadd.f32 %v2895_v21, %v3981_v55 }
 0x3c2   :  { %v4052_v24 = vadd.f32 %v3981_v55, %v1812_v23 }
 0x3c3   :  { %v1946_v41 = vsel %vm116_vm1, %v4055_v25, -inf }
 0x3c4   :  { %1941 = vmax.xlane.f32.xlu1 %v1940_v26  ;;  %v1943_v46 = vsel %vm116_vm1, %v4052_v24, -inf }
 0x3c5   :  { %1944 = vmax.xlane.f32.xlu0 %v1943_v46 }
 0x3c6   :  { %v2898_v48 = vpop.f32.mrb[48].mxu0 }
 0x3c7   :  { %v4062_v27 = vadd.f32 %v2898_v48, %v3981_v55  ;;  %v1822_v28 = vpop.f32.mrb[49].mxu0 }
 0x3c8   :  { %v4067_v52 = vadd.f32 %v3981_v55, %v1822_v28  ;;  %1947 = vmax.xlane.f32.xlu1 %v1946_v41 }
 0x3c9   :  { %v1952_v39 = vsel %vm116_vm1, %v4062_v27, -inf }
 0x3ca   :  { %v2901_v43 = vpop.f32.mrb[50].mxu0  ;;  %v1949_v54 = vsel %vm116_vm1, %v4067_v52, -inf }
 0x3cb   :  { %v4072_v44 = vadd.f32 %v2901_v43, %v3981_v55  ;;  %v1832_v45 = vpop.f32.mrb[51].mxu0  ;;  %1950 = vmax.xlane.f32.xlu0 %v1949_v54 }
 0x3cc   :  { %v4077_v47 = vadd.f32 %v3981_v55, %v1832_v45  ;;  %1953 = vmax.xlane.f32.xlu1 %v1952_v39 }
 0x3cd   :  { %v1958_v29 = vsel %vm116_vm1, %v4072_v44, -inf }
 0x3ce   :  { %v2904_v49 = vpop.f32.mrb[52].mxu0  ;;  %v1955_v50 = vsel %vm116_vm1, %v4077_v47, -inf }
 0x3cf   :  { %v4082_v53 = vadd.f32 %v2904_v49, %v3981_v55  ;;  %v1842_v14 = vpop.f32.mrb[53].mxu0  ;;  %1956 = vmax.xlane.f32.xlu0 %v1955_v50 }
 0x3d0   :  { %v4087_v30 = vadd.f32 %v3981_v55, %v1842_v14  ;;  %1959 = vmax.xlane.f32.xlu1 %v1958_v29 }
 0x3d1   :  { %v1964_v32 = vsel %vm116_vm1, %v4082_v53, -inf }
 0x3d2   :  { %v2907_v57 = vpop.f32.mrb[54].mxu0  ;;  %v1961_v2 = vsel %vm116_vm1, %v4087_v30, -inf }
 0x3d3   :  { %v4092_v59 = vadd.f32 %v2907_v57, %v3981_v55  ;;  %v1852_v60 = vpop.f32.mrb[55].mxu0  ;;  %1962 = vmax.xlane.f32.xlu0 %v1961_v2 }
 0x3d4   :  { %v4097_v62 = vadd.f32 %v3981_v55, %v1852_v60  ;;  %1965 = vmax.xlane.f32.xlu1 %v1964_v32 }
 0x3d5   :  { %v1970_v4 = vsel %vm116_vm1, %v4092_v59, -inf }
 0x3d6   :  { %v2910_v63 = vpop.f32.mrb[56].mxu0  ;;  %v1967_v0 = vsel %vm116_vm1, %v4097_v62, -inf }
 0x3d7   :  { %v4102_v3 = vadd.f32 %v2910_v63, %v3981_v55  ;;  %v1862_v34 = vpop.f32.mrb[57].mxu0  ;;  %1968 = vmax.xlane.f32.xlu0 %v1967_v0 }
 0x3d8   :  { %v4107_v5 = vadd.f32 %v3981_v55, %v1862_v34  ;;  %1971 = vmax.xlane.f32.xlu1 %v1970_v4 }
 0x3d9   :  { %v1976_v12 = vsel %vm116_vm1, %v4102_v3, -inf }
 0x3da   :  { %v2913_v8 = vpop.f32.mrb[58].mxu0  ;;  %v1973_v35 = vsel %vm116_vm1, %v4107_v5, -inf }
 0x3db   :  { %v4112_v9 = vadd.f32 %v2913_v8, %v3981_v55  ;;  %v1872_v36 = vpop.f32.mrb[59].mxu0  ;;  %1974 = vmax.xlane.f32.xlu0 %v1973_v35 }
 0x3dc   :  { %v4117_v51 = vadd.f32 %v3981_v55, %v1872_v36  ;;  %1977 = vmax.xlane.f32.xlu1 %v1976_v12 }
 0x3dd   :  { %v1982_v18 = vsel %vm116_vm1, %v4112_v9, -inf }
 0x3de   :  { %v2916_v13 = vpop.f32.mrb[60].mxu0  ;;  %v1979_v37 = vsel %vm116_vm1, %v4117_v51, -inf }
 0x3df   :  { %v4122_v16 = vadd.f32 %v2916_v13, %v3981_v55  ;;  %v1882_v17 = vpop.f32.mrb[61].mxu0  ;;  %1980 = vmax.xlane.f32.xlu0 %v1979_v37 }
 0x3e0   :  { %v4127_v19 = vadd.f32 %v3981_v55, %v1882_v17  ;;  %1983 = vmax.xlane.f32.xlu1 %v1982_v18 }
 0x3e1   :  { %v1988_v26 = vsel %vm116_vm1, %v4122_v16, -inf }
 0x3e2   :  { %v2919_v42 = vpop.f32.mrb[62].mxu0  ;;  %v1985_v21 = vsel %vm116_vm1, %v4127_v19, -inf }
 0x3e3   :  { %v4132_v22 = vadd.f32 %v2919_v42, %v3981_v55  ;;  %v1892_v23 = vpop.f32.mrb[63].mxu0  ;;  %1986 = vmax.xlane.f32.xlu0 %v1985_v21 }
 0x3e4   :  { %v4137_v46 = vadd.f32 %v3981_v55, %v1892_v23  ;;  %1989 = vmax.xlane.f32.xlu1 %v1988_v26 }
 0x3e5   :  { %v1994_v28 = vsel %vm116_vm1, %v4132_v22, -inf }
 0x3e6   :  { %v1991_v48 = vsel %vm116_vm1, %v4137_v46, -inf }
 0x3e7   :  { %1992 = vmax.xlane.f32.xlu0 %v1991_v48 }
 0x3e8   :  { %1995 = vmax.xlane.f32.xlu1 %v1994_v28 }
 0x435   :  { %v1906_v41 = vpop.xlane.xlu0 %1905 }
 0x436   :  { %v1998_v43 = vsub.f32 %v3984_v56, %v1906_v41 }
 0x438   :  { %v2031_v54 = vmul.f32 1.442695, %v1998_v43 }
 0x439   :  { %v1912_v45 = vpop.xlane.xlu1 %1911  ;;  %v1903_v39 = vpop.xlane.xlu0 %1902 }
 0x43a   :  { %3193 = vpow2.f32 %v2031_v54  ;;  %v2000_v49 = vsub.f32 %v3992_v31, %v1912_v45  ;;  %v1997_v55 = vsub.f32 %v3987_v58, %v1903_v39 }
 0x43c   :  { %v2035_v50 = vmul.f32 1.442695, %v2000_v49  ;;  %v2029_v14 = vmul.f32 1.442695, %v1997_v55 }
 0x43d   :  { %v1909_v29 = vpop.xlane.xlu1 %1908 }
 0x43e   :  { %3195 = vpow2.f32 %v2035_v50  ;;  %v1999_v57 = vsub.f32 %v3995_v61, %v1909_v29  ;;  %v1915_v2 = vpop.xlane.xlu0 %1914 }
 0x43f   :  { %3197 = vpow2.f32 %v2029_v14  ;;  %v2001_v60 = vsub.f32 %v4002_v1, %v1915_v2 }
 0x440   :  { %v2033_v32 = vmul.f32 1.442695, %v1999_v57 }
 0x441   :  { %v2037_v56 = vmul.f32 1.442695, %v2001_v60  ;;  %v1918_v63 = vpop.xlane.xlu1 %1917 }
 0x442   :  { %3199 = vpow2.f32 %v2033_v32  ;;  %v2002_v0 = vsub.f32 %v4005_v33, %v1918_v63  ;;  %v1921_v34 = vpop.xlane.xlu0 %1920 }
 0x443   :  { %v2003_v31 = vsub.f32 %v4012_v6, %v1921_v34  ;;  %3201 = vpow2.f32 %v2037_v56 }
 0x444   :  { %v4150_v58 = vpop.eup %3193  ;;  %v2039_v4 = vmul.f32 1.442695, %v2002_v0 }
 0x445   :  { %v2041_v8 = vmul.f32 1.442695, %v2003_v31  ;;  %v1924_v35 = vpop.xlane.xlu1 %1923  ;;  %v2096_v61 = vsel %vm116_vm1, %v4150_v58, 0.0 }
 0x446   :  { %3203 = vpow2.f32 %v2039_v4  ;;  %v2004_v1 = vsub.f32 %v4015_v7, %v1924_v35  ;;  %v1927_v36 = vpop.xlane.xlu0 %1926  ;;  %2097 = vadd.xlane.f32.xlu1 %v2096_v61 }
 0x447   :  { %v2005_v12 = vsub.f32 %v4022_v10, %v1927_v36  ;;  %3205 = vpow2.f32 %v2041_v8 }
 0x448   :  { %v4156_v33 = vpop.eup %3195  ;;  %v2043_v13 = vmul.f32 1.442695, %v2004_v1 }
 0x449   :  { %v4158_v6 = vpop.eup %3197  ;;  %v2045_v37 = vmul.f32 1.442695, %v2005_v12  ;;  %v1930_v17 = vpop.xlane.xlu1 %1929  ;;  %v2102_v18 = vsel %vm116_vm1, %v4156_v33, 0.0 }
 0x44a   :  { %3207 = vpow2.f32 %v2043_v13  ;;  %v2006_v42 = vsub.f32 %v4025_v11, %v1930_v17  ;;  %v1933_v21 = vpop.xlane.xlu0 %1932  ;;  %2103 = vadd.xlane.f32.xlu1 %v2102_v18  ;;  %v2093_v7 = vsel %vm116_vm1, %v4158_v6, 0.0 }
 0x44b   :  { %v2007_v10 = vsub.f32 %v4032_v38, %v1933_v21  ;;  %2094 = vadd.xlane.f32.xlu0 %v2093_v7  ;;  %3209 = vpow2.f32 %v2045_v37 }
 0x44c   :  { %v4166_v23 = vpop.eup %3199  ;;  %v2047_v26 = vmul.f32 1.442695, %v2006_v42 }
 0x44d   :  { %v2049_v48 = vmul.f32 1.442695, %v2007_v10  ;;  %v1936_v28 = vpop.xlane.xlu1 %1935  ;;  %v2099_v41 = vsel %vm116_vm1, %v4166_v23, 0.0  ;;  %v4171_v54 = vpop.eup %3201 }
 0x44e   :  { %3211 = vpow2.f32 %v2047_v26  ;;  %v2008_v11 = vsub.f32 %v4035_v15, %v1936_v28  ;;  %v1939_v43 = vpop.xlane.xlu0 %1938  ;;  %v2105_v15 = vsel %vm116_vm1, %v4171_v54, 0.0 }
 0x44f   :  { %v2009_v45 = vsub.f32 %v4042_v20, %v1939_v43  ;;  %2100 = vadd.xlane.f32.xlu0 %v2099_v41  ;;  %3213 = vpow2.f32 %v2049_v48 }
 0x450   :  { %v4174_v38 = vpop.eup %3203  ;;  %v2051_v39 = vmul.f32 1.442695, %v2008_v11 }
 0x451   :  { %v2053_v49 = vmul.f32 1.442695, %v2009_v45  ;;  %v1942_v55 = vpop.xlane.xlu1 %1941  ;;  %v2108_v50 = vsel %vm116_vm1, %v4174_v38, 0.0  ;;  %v4181_v57 = vpop.eup %3205 }
 0x452   :  { %3215 = vpow2.f32 %v2051_v39  ;;  %v2010_v14 = vsub.f32 %v4045_v40, %v1942_v55  ;;  %v1945_v29 = vpop.xlane.xlu0 %1944  ;;  %2109 = vadd.xlane.f32.xlu1 %v2108_v50  ;;  %v2111_v0 = vsel %vm116_vm1, %v4181_v57, 0.0 }
 0x453   :  { %v2011_v20 = vsub.f32 %v4052_v24, %v1945_v29  ;;  %2106 = vadd.xlane.f32.xlu0 %v2105_v15  ;;  %3217 = vpow2.f32 %v2053_v49 }
 0x454   :  { %v4184_v2 = vpop.eup %3207  ;;  %v2055_v60 = vmul.f32 1.442695, %v2010_v14 }
 0x455   :  { %v2057_v32 = vmul.f32 1.442695, %v2011_v20  ;;  %v1948_v56 = vpop.xlane.xlu1 %1947  ;;  %v2114_v63 = vsel %vm116_vm1, %v4184_v2, 0.0  ;;  %v4191_v34 = vpop.eup %3209 }
 0x456   :  { %3219 = vpow2.f32 %v2055_v60  ;;  %v2012_v40 = vsub.f32 %v4055_v25, %v1948_v56  ;;  %2115 = vadd.xlane.f32.xlu1 %v2114_v63  ;;  %v2117_v1 = vsel %vm116_vm1, %v4191_v34, 0.0 }
 0x457   :  { %2112 = vadd.xlane.f32.xlu0 %v2111_v0  ;;  %3221 = vpow2.f32 %v2057_v32 }
 0x458   :  { %v4193_v24 = vpop.eup %3211  ;;  %v2059_v31 = vmul.f32 1.442695, %v2012_v40  ;;  %v1951_v4 = vpop.xlane.xlu0 %1950 }
 0x459   :  { %v2013_v8 = vsub.f32 %v4067_v52, %v1951_v4  ;;  %v1954_v35 = vpop.xlane.xlu1 %1953  ;;  %v2120_v61 = vsel %vm116_vm1, %v4193_v24, 0.0  ;;  %v4201_v36 = vpop.eup %3213 }
 0x45a   :  { %3223 = vpow2.f32 %v2059_v31  ;;  %v2014_v25 = vsub.f32 %v4062_v27, %v1954_v35  ;;  %2121 = vadd.xlane.f32.xlu1 %v2120_v61  ;;  %v2123_v21 = vsel %vm116_vm1, %v4201_v36, 0.0 }
 0x45b   :  { %v2061_v12 = vmul.f32 1.442695, %v2013_v8  ;;  %2118 = vadd.xlane.f32.xlu0 %v2117_v1 }
 0x45c   :  { %v4203_v13 = vpop.eup %3215  ;;  %v2063_v37 = vmul.f32 1.442695, %v2014_v25  ;;  %v1957_v17 = vpop.xlane.xlu0 %1956 }
 0x45d   :  { %3225 = vpow2.f32 %v2061_v12  ;;  %v2015_v52 = vsub.f32 %v4077_v47, %v1957_v17  ;;  %v1960_v18 = vpop.xlane.xlu1 %1959  ;;  %v2126_v42 = vsel %vm116_vm1, %v4203_v13, 0.0  ;;  %v4211_v7 = vpop.eup %3217 }
 0x45e   :  { %3227 = vpow2.f32 %v2063_v37  ;;  %v2016_v27 = vsub.f32 %v4072_v44, %v1960_v18  ;;  %2127 = vadd.xlane.f32.xlu1 %v2126_v42  ;;  %v2129_v43 = vsel %vm116_vm1, %v4211_v7, 0.0 }
 0x45f   :  { %v2065_v10 = vmul.f32 1.442695, %v2015_v52  ;;  %2124 = vadd.xlane.f32.xlu0 %v2123_v21 }
 0x460   :  { %v4213_v26 = vpop.eup %3219  ;;  %v2067_v48 = vmul.f32 1.442695, %v2016_v27  ;;  %v1963_v28 = vpop.xlane.xlu0 %1962 }
 0x461   :  { %3229 = vpow2.f32 %v2065_v10  ;;  %v2017_v47 = vsub.f32 %v4087_v30, %v1963_v28  ;;  %v1966_v41 = vpop.xlane.xlu1 %1965  ;;  %v2132_v11 = vsel %vm116_vm1, %v4213_v26, 0.0  ;;  %v4221_v45 = vpop.eup %3221 }
 0x462   :  { %3231 = vpow2.f32 %v2067_v48  ;;  %v2018_v44 = vsub.f32 %v4082_v53, %v1966_v41  ;;  %2133 = vadd.xlane.f32.xlu1 %v2132_v11  ;;  %v2135_v15 = vsel %vm116_vm1, %v4221_v45, 0.0 }
 0x463   :  { %v2069_v39 = vmul.f32 1.442695, %v2017_v47  ;;  %2130 = vadd.xlane.f32.xlu0 %v2129_v43 }
 0x464   :  { %v4223_v49 = vpop.eup %3223  ;;  %v2071_v55 = vmul.f32 1.442695, %v2018_v44  ;;  %v1969_v50 = vpop.xlane.xlu0 %1968 }
 0x465   :  { %3233 = vpow2.f32 %v2069_v39  ;;  %v2019_v30 = vsub.f32 %v4097_v62, %v1969_v50  ;;  %v1972_v14 = vpop.xlane.xlu1 %1971  ;;  %v2138_v29 = vsel %vm116_vm1, %v4223_v49, 0.0 }
 0x466   :  { %3235 = vpow2.f32 %v2071_v55  ;;  %v2020_v53 = vsub.f32 %v4092_v59, %v1972_v14  ;;  %2139 = vadd.xlane.f32.xlu1 %v2138_v29 }
 0x467   :  { %v4231_v20 = vpop.eup %3225  ;;  %v2073_v60 = vmul.f32 1.442695, %v2019_v30  ;;  %2136 = vadd.xlane.f32.xlu0 %v2135_v15 }
 0x468   :  { %v4233_v32 = vpop.eup %3227  ;;  %v2075_v56 = vmul.f32 1.442695, %v2020_v53  ;;  %v1975_v63 = vpop.xlane.xlu0 %1974  ;;  %v2141_v62 = vsel %vm116_vm1, %v4231_v20, 0.0 }
 0x469   :  { %3237 = vpow2.f32 %v2073_v60  ;;  %v2021_v40 = vsub.f32 %v4107_v5, %v1975_v63  ;;  %v1978_v0 = vpop.xlane.xlu1 %1977  ;;  %v2144_v59 = vsel %vm116_vm1, %v4233_v32, 0.0 }
 0x46a   :  { %3239 = vpow2.f32 %v2075_v56  ;;  %v2022_v31 = vsub.f32 %v4102_v3, %v1978_v0  ;;  %2145 = vadd.xlane.f32.xlu1 %v2144_v59 }
 0x46b   :  { %v4241_v4 = vpop.eup %3229  ;;  %v2077_v8 = vmul.f32 1.442695, %v2021_v40  ;;  %2142 = vadd.xlane.f32.xlu0 %v2141_v62 }
 0x46c   :  { %v4243_v35 = vpop.eup %3231  ;;  %v2079_v61 = vmul.f32 1.442695, %v2022_v31  ;;  %v1981_v25 = vpop.xlane.xlu0 %1980  ;;  %v2147_v1 = vsel %vm116_vm1, %v4241_v4, 0.0 }
 0x46d   :  { %3241 = vpow2.f32 %v2077_v8  ;;  %v2023_v5 = vsub.f32 %v4117_v51, %v1981_v25  ;;  %v1984_v12 = vpop.xlane.xlu1 %1983  ;;  %v2150_v37 = vsel %vm116_vm1, %v4243_v35, 0.0 }
 0x46e   :  { %3243 = vpow2.f32 %v2079_v61  ;;  %v2024_v3 = vsub.f32 %v4112_v9, %v1984_v12  ;;  %2151 = vadd.xlane.f32.xlu1 %v2150_v37 }
 0x46f   :  { %v4251_v17 = vpop.eup %3233  ;;  %v2081_v52 = vmul.f32 1.442695, %v2023_v5  ;;  %2148 = vadd.xlane.f32.xlu0 %v2147_v1 }
 0x470   :  { %v4253_v18 = vpop.eup %3235  ;;  %v2083_v42 = vmul.f32 1.442695, %v2024_v3  ;;  %v1987_v27 = vpop.xlane.xlu0 %1986  ;;  %v2153_v21 = vsel %vm116_vm1, %v4251_v17, 0.0 }
 0x471   :  { %3245 = vpow2.f32 %v2081_v52  ;;  %v2025_v51 = vsub.f32 %v4127_v19, %v1987_v27  ;;  %v1990_v10 = vpop.xlane.xlu1 %1989  ;;  %v2156_v48 = vsel %vm116_vm1, %v4253_v18, 0.0 }
 0x472   :  { %3247 = vpow2.f32 %v2083_v42  ;;  %v2026_v9 = vsub.f32 %v4122_v16, %v1990_v10  ;;  %2157 = vadd.xlane.f32.xlu1 %v2156_v48 }
 0x473   :  { %v4261_v28 = vpop.eup %3237  ;;  %v2085_v47 = vmul.f32 1.442695, %v2025_v51  ;;  %2154 = vadd.xlane.f32.xlu0 %v2153_v21 }
 0x474   :  { %v4263_v41 = vpop.eup %3239  ;;  %v2087_v11 = vmul.f32 1.442695, %v2026_v9  ;;  %v1993_v44 = vpop.xlane.xlu0 %1992  ;;  %v2159_v43 = vsel %vm116_vm1, %v4261_v28, 0.0 }
 0x475   :  { %3249 = vpow2.f32 %v2085_v47  ;;  %v2027_v19 = vsub.f32 %v4137_v46, %v1993_v44  ;;  %v1996_v39 = vpop.xlane.xlu1 %1995  ;;  %v2162_v55 = vsel %vm116_vm1, %v4263_v41, 0.0 }
 0x476   :  { %3251 = vpow2.f32 %v2087_v11  ;;  %v2028_v16 = vsub.f32 %v4132_v22, %v1996_v39  ;;  %2163 = vadd.xlane.f32.xlu1 %v2162_v55 }
 0x477   :  { %v4271_v50 = vpop.eup %3241  ;;  %v2089_v30 = vmul.f32 1.442695, %v2027_v19  ;;  %2160 = vadd.xlane.f32.xlu0 %v2159_v43 }
 0x478   :  { %v4273_v14 = vpop.eup %3243  ;;  %v2091_v29 = vmul.f32 1.442695, %v2028_v16  ;;  %v2165_v53 = vsel %vm116_vm1, %v4271_v50, 0.0 }
 0x479   :  { %3253 = vpow2.f32 %v2089_v30  ;;  %v2168_v46 = vsel %vm116_vm1, %v4273_v14, 0.0 }
 0x47a   :  { %3255 = vpow2.f32 %v2091_v29  ;;  %2169 = vadd.xlane.f32.xlu1 %v2168_v46 }
 0x47b   :  { %v4279_v15 = vpop.eup %3245  ;;  %2166 = vadd.xlane.f32.xlu0 %v2165_v53 }
 0x47c   :  { %v4281_v22 = vpop.eup %3247  ;;  %v2171_v60 = vsel %vm116_vm1, %v4279_v15, 0.0 }
 0x47d   :  { %v2174_v56 = vsel %vm116_vm1, %v4281_v22, 0.0 }
 0x47e   :  { %2175 = vadd.xlane.f32.xlu1 %v2174_v56 }
 0x47f   :  { %v4287_v63 = vpop.eup %3249  ;;  %2172 = vadd.xlane.f32.xlu0 %v2171_v60 }
 0x480   :  { %v4289_v62 = vpop.eup %3251  ;;  %v2177_v40 = vsel %vm116_vm1, %v4287_v63, 0.0 }
 0x481   :  { %v2180_v0 = vsel %vm116_vm1, %v4289_v62, 0.0 }
 0x482   :  { %2181 = vadd.xlane.f32.xlu1 %v2180_v0 }
 0x483   :  { %v4295_v59 = vpop.eup %3253  ;;  %2178 = vadd.xlane.f32.xlu0 %v2177_v40 }
 0x484   :  { %v4297_v31 = vpop.eup %3255  ;;  %v2183_v8 = vsel %vm116_vm1, %v4295_v59, 0.0 }
 0x485   :  { %v2186_v61 = vsel %vm116_vm1, %v4297_v31, 0.0 }
 0x486   :  { %2187 = vadd.xlane.f32.xlu1 %v2186_v61 }
 0x487   :  { %2184 = vadd.xlane.f32.xlu0 %v2183_v8 }
 0x4d3   :  { %v2098_v25 = vpop.xlane.xlu1 %2097 }
 0x4d4   :  { %3257 = vrcp.f32 %v2098_v25 }
 0x4d7   :  { %v2104_v1 = vpop.xlane.xlu1 %2103 }
 0x4d8   :  { %3259 = vrcp.f32 %v2104_v1  ;;  %v2095_v5 = vpop.xlane.xlu0 %2094 }
 0x4d9   :  { %3261 = vrcp.f32 %v2095_v5 }
 0x4dc   :  { %v2101_v12 = vpop.xlane.xlu0 %2100 }
 0x4dd   :  { %3263 = vrcp.f32 %v2101_v12 }
 0x4de   :  { %v3258_v37 = vpop.eup %3257 }
 0x4df   :  { %v2222_v3 = vmul.f32 %v3258_v37, %v4150_v58  ;;  %v2110_v52 = vpop.xlane.xlu1 %2109 }
 0x4e0   :  { %3265 = vrcp.f32 %v2110_v52  ;;  %v2107_v42 = vpop.xlane.xlu0 %2106 }
 0x4e1   :  { %2254 = vst.msk [vmem:[%s4474_s11 + $0x8] sm:$0xff] %vm116_vm1, %v2222_v3  ;;  %3267 = vrcp.f32 %v2107_v42 }
 0x4e2   :  { %v3260_v27 = vpop.eup %3259 }
 0x4e3   :  { %v3262_v21 = vpop.eup %3261  ;;  %v2224_v51 = vmul.f32 %v3260_v27, %v4156_v33  ;;  %v2116_v10 = vpop.xlane.xlu1 %2115 }
 0x4e4   :  { %v2221_v48 = vmul.f32 %v3262_v21, %v4158_v6  ;;  %3269 = vrcp.f32 %v2116_v10  ;;  %v2113_v9 = vpop.xlane.xlu0 %2112 }
 0x4e5   :  { %2256 = vst.msk [vmem:[%s4474_s11 + $0x18] sm:$0xff] %vm116_vm1, %v2224_v51  ;;  %3271 = vrcp.f32 %v2113_v9 }
 0x4e6   :  { %2253 = vst.msk [vmem:[%s4474_s11] sm:$0xff] %vm116_vm1, %v2221_v48 }
 0x4e7   :  { %v3264_v58 = vpop.eup %3263  ;;  %v2122_v47 = vpop.xlane.xlu1 %2121 }
 0x4e8   :  { %v2223_v33 = vmul.f32 %v3264_v58, %v4166_v23  ;;  %3273 = vrcp.f32 %v2122_v47  ;;  %v2119_v11 = vpop.xlane.xlu0 %2118 }
 0x4e9   :  { %3275 = vrcp.f32 %v2119_v11 }
 0x4ea   :  { %v3266_v6 = vpop.eup %3265  ;;  %2255 = vst.msk [vmem:[%s4474_s11 + $0x10] sm:$0xff] %vm116_vm1, %v2223_v33 }
 0x4eb   :  { %v3268_v44 = vpop.eup %3267  ;;  %v2226_v43 = vmul.f32 %v3266_v6, %v4174_v38  ;;  %v2128_v19 = vpop.xlane.xlu1 %2127 }
 0x4ec   :  { %v2225_v39 = vmul.f32 %v3268_v44, %v4171_v54  ;;  %3277 = vrcp.f32 %v2128_v19  ;;  %v2125_v55 = vpop.xlane.xlu0 %2124 }
 0x4ed   :  { %2258 = vst.msk [vmem:[%s4474_s11 + $0x28] sm:$0xff] %vm116_vm1, %v2226_v43  ;;  %3279 = vrcp.f32 %v2125_v55 }
 0x4ee   :  { %v3270_v23 = vpop.eup %3269  ;;  %2257 = vst.msk [vmem:[%s4474_s11 + $0x20] sm:$0xff] %vm116_vm1, %v2225_v39 }
 0x4ef   :  { %v3272_v16 = vpop.eup %3271  ;;  %v2228_v38 = vmul.f32 %v3270_v23, %v4184_v2  ;;  %v2134_v30 = vpop.xlane.xlu1 %2133 }
 0x4f0   :  { %v2227_v54 = vmul.f32 %v3272_v16, %v4181_v57  ;;  %3281 = vrcp.f32 %v2134_v30  ;;  %v2131_v29 = vpop.xlane.xlu0 %2130 }
 0x4f1   :  { %2260 = vst.msk [vmem:[%s4474_s11 + $0x38] sm:$0xff] %vm116_vm1, %v2228_v38  ;;  %3283 = vrcp.f32 %v2131_v29 }
 0x4f2   :  { %v3274_v53 = vpop.eup %3273  ;;  %2259 = vst.msk [vmem:[%s4474_s11 + $0x30] sm:$0xff] %vm116_vm1, %v2227_v54 }
 0x4f3   :  { %v3276_v46 = vpop.eup %3275  ;;  %v2230_v2 = vmul.f32 %v3274_v53, %v4193_v24  ;;  %v2140_v60 = vpop.xlane.xlu1 %2139 }
 0x4f4   :  { %v2229_v57 = vmul.f32 %v3276_v46, %v4191_v34  ;;  %3285 = vrcp.f32 %v2140_v60  ;;  %v2137_v56 = vpop.xlane.xlu0 %2136 }
 0x4f5   :  { %2262 = vst.msk [vmem:[%s4474_s11 + $0x48] sm:$0xff] %vm116_vm1, %v2230_v2  ;;  %3287 = vrcp.f32 %v2137_v56 }
 0x4f6   :  { %v3278_v40 = vpop.eup %3277  ;;  %2261 = vst.msk [vmem:[%s4474_s11 + $0x40] sm:$0xff] %vm116_vm1, %v2229_v57 }
 0x4f7   :  { %v3280_v0 = vpop.eup %3279  ;;  %v2232_v24 = vmul.f32 %v3278_v40, %v4203_v13  ;;  %v2146_v8 = vpop.xlane.xlu1 %2145 }
 0x4f8   :  { %v2231_v34 = vmul.f32 %v3280_v0, %v4201_v36  ;;  %3289 = vrcp.f32 %v2146_v8  ;;  %v2143_v61 = vpop.xlane.xlu0 %2142 }
 0x4f9   :  { %2264 = vst.msk [vmem:[%s4474_s11 + $0x58] sm:$0xff] %vm116_vm1, %v2232_v24  ;;  %3291 = vrcp.f32 %v2143_v61 }
 0x4fa   :  { %v3282_v25 = vpop.eup %3281  ;;  %2263 = vst.msk [vmem:[%s4474_s11 + $0x50] sm:$0xff] %vm116_vm1, %v2231_v34 }
 0x4fb   :  { %v3284_v1 = vpop.eup %3283  ;;  %v2234_v13 = vmul.f32 %v3282_v25, %v4213_v26  ;;  %v2152_v5 = vpop.xlane.xlu1 %2151 }
 0x4fc   :  { %v2233_v36 = vmul.f32 %v3284_v1, %v4211_v7  ;;  %3293 = vrcp.f32 %v2152_v5  ;;  %v2149_v12 = vpop.xlane.xlu0 %2148 }
 0x4fd   :  { %2266 = vst.msk [vmem:[%s4474_s11 + $0x68] sm:$0xff] %vm116_vm1, %v2234_v13  ;;  %3295 = vrcp.f32 %v2149_v12 }
 0x4fe   :  { %v3286_v37 = vpop.eup %3285  ;;  %2265 = vst.msk [vmem:[%s4474_s11 + $0x60] sm:$0xff] %vm116_vm1, %v2233_v36 }
 0x4ff   :  { %v3288_v3 = vpop.eup %3287  ;;  %v2236_v26 = vmul.f32 %v3286_v37, %v4223_v49  ;;  %v2158_v52 = vpop.xlane.xlu1 %2157 }
 0x500   :  { %v2235_v7 = vmul.f32 %v3288_v3, %v4221_v45  ;;  %3297 = vrcp.f32 %v2158_v52  ;;  %v2155_v42 = vpop.xlane.xlu0 %2154 }
 0x501   :  { %2268 = vst.msk [vmem:[%s4474_s11 + $0x78] sm:$0xff] %vm116_vm1, %v2236_v26  ;;  %3299 = vrcp.f32 %v2155_v42 }
 0x502   :  { %v3290_v27 = vpop.eup %3289  ;;  %2267 = vst.msk [vmem:[%s4474_s11 + $0x70] sm:$0xff] %vm116_vm1, %v2235_v7 }
 0x503   :  { %v3292_v21 = vpop.eup %3291  ;;  %v2238_v49 = vmul.f32 %v3290_v27, %v4233_v32  ;;  %v2164_v51 = vpop.xlane.xlu1 %2163 }
 0x504   :  { %v2237_v45 = vmul.f32 %v3292_v21, %v4231_v20  ;;  %3301 = vrcp.f32 %v2164_v51  ;;  %v2161_v10 = vpop.xlane.xlu0 %2160 }
 0x505   :  { %2270 = vst.msk [vmem:[%s4474_s11 + $0x88] sm:$0xff] %vm116_vm1, %v2238_v49  ;;  %3303 = vrcp.f32 %v2161_v10 }
 0x506   :  { %v3294_v48 = vpop.eup %3293  ;;  %2269 = vst.msk [vmem:[%s4474_s11 + $0x80] sm:$0xff] %vm116_vm1, %v2237_v45 }
 0x507   :  { %v3296_v9 = vpop.eup %3295  ;;  %v2240_v32 = vmul.f32 %v3294_v48, %v4243_v35  ;;  %v2170_v58 = vpop.xlane.xlu1 %2169 }
 0x508   :  { %v2239_v20 = vmul.f32 %v3296_v9, %v4241_v4  ;;  %3305 = vrcp.f32 %v2170_v58  ;;  %v2167_v47 = vpop.xlane.xlu0 %2166 }
 0x509   :  { %2272 = vst.msk [vmem:[%s4474_s11 + $0x98] sm:$0xff] %vm116_vm1, %v2240_v32  ;;  %3307 = vrcp.f32 %v2167_v47 }
 0x50a   :  { %v3298_v33 = vpop.eup %3297  ;;  %2271 = vst.msk [vmem:[%s4474_s11 + $0x90] sm:$0xff] %vm116_vm1, %v2239_v20 }
 0x50b   :  { %v3300_v11 = vpop.eup %3299  ;;  %v2242_v35 = vmul.f32 %v3298_v33, %v4253_v18  ;;  %v2176_v6 = vpop.xlane.xlu1 %2175 }
 0x50c   :  { %v2241_v4 = vmul.f32 %v3300_v11, %v4251_v17  ;;  %3309 = vrcp.f32 %v2176_v6  ;;  %v2173_v44 = vpop.xlane.xlu0 %2172 }
 0x50d   :  { %2274 = vst.msk [vmem:[%s4474_s11 + $0xa8] sm:$0xff] %vm116_vm1, %v2242_v35  ;;  %3311 = vrcp.f32 %v2173_v44 }
 0x50e   :  { %v3302_v43 = vpop.eup %3301  ;;  %2273 = vst.msk [vmem:[%s4474_s11 + $0xa0] sm:$0xff] %vm116_vm1, %v2241_v4 }
 0x50f   :  { %v3304_v19 = vpop.eup %3303  ;;  %v2244_v18 = vmul.f32 %v3302_v43, %v4263_v41  ;;  %v2182_v39 = vpop.xlane.xlu1 %2181 }
 0x510   :  { %v2243_v17 = vmul.f32 %v3304_v19, %v4261_v28  ;;  %3313 = vrcp.f32 %v2182_v39  ;;  %v2179_v55 = vpop.xlane.xlu0 %2178 }
 0x511   :  { %2276 = vst.msk [vmem:[%s4474_s11 + $0xb8] sm:$0xff] %vm116_vm1, %v2244_v18  ;;  %3315 = vrcp.f32 %v2179_v55 }
 0x512   :  { %v3306_v23 = vpop.eup %3305  ;;  %2275 = vst.msk [vmem:[%s4474_s11 + $0xb0] sm:$0xff] %vm116_vm1, %v2243_v17 }
 0x513   :  { %v3308_v16 = vpop.eup %3307  ;;  %v2246_v41 = vmul.f32 %v3306_v23, %v4273_v14  ;;  %v2188_v38 = vpop.xlane.xlu1 %2187 }
 0x514   :  { %v2245_v28 = vmul.f32 %v3308_v16, %v4271_v50  ;;  %3317 = vrcp.f32 %v2188_v38  ;;  %v2185_v30 = vpop.xlane.xlu0 %2184 }
 0x515   :  { %2278 = vst.msk [vmem:[%s4474_s11 + $0xc8] sm:$0xff] %vm116_vm1, %v2246_v41  ;;  %3319 = vrcp.f32 %v2185_v30 }
 0x516   :  { %v3310_v54 = vpop.eup %3309  ;;  %2277 = vst.msk [vmem:[%s4474_s11 + $0xc0] sm:$0xff] %vm116_vm1, %v2245_v28 }
 0x517   :  { %v3312_v29 = vpop.eup %3311  ;;  %v2248_v14 = vmul.f32 %v3310_v54, %v4281_v22 }
 0x518   :  { %v2247_v53 = vmul.f32 %v3312_v29, %v4279_v15 }
 0x519   :  { %2280 = vst.msk [vmem:[%s4474_s11 + $0xd8] sm:$0xff] %vm116_vm1, %v2248_v14 }
 0x51a   :  { %v3314_v50 = vpop.eup %3313  ;;  %2279 = vst.msk [vmem:[%s4474_s11 + $0xd0] sm:$0xff] %vm116_vm1, %v2247_v53 }
 0x51b   :  { %v3316_v46 = vpop.eup %3315  ;;  %v2250_v2 = vmul.f32 %v3314_v50, %v4289_v62 }
 0x51c   :  { %v2249_v60 = vmul.f32 %v3316_v46, %v4287_v63 }
 0x51d   :  { %2282 = vst.msk [vmem:[%s4474_s11 + $0xe8] sm:$0xff] %vm116_vm1, %v2250_v2 }
 0x51e   :  { %v3318_v15 = vpop.eup %3317  ;;  %2281 = vst.msk [vmem:[%s4474_s11 + $0xe0] sm:$0xff] %vm116_vm1, %v2249_v60 }
 0x51f   :  { %v3320_v22 = vpop.eup %3319  ;;  %v2252_v57 = vmul.f32 %v3318_v15, %v4297_v31 }
 0x520   :  { %v2251_v56 = vmul.f32 %v3320_v22, %v4295_v59 }
 0x521   :  { %2284 = vst.msk [vmem:[%s4474_s11 + $0xf8] sm:$0xff] %vm116_vm1, %v2252_v57 }
 0x522   :  { %2283 = vst.msk [vmem:[%s4474_s11 + $0xf0] sm:$0xff] %vm116_vm1, %v2251_v56 }

</bundles_post_ra>
